<compile_context>
chip_gen: v6e
topology: v6e:2x2x1
jax: 0.10.0
libtpu: 0.0.40
codegen_flags: <defaults>
</compile_context>

<pallas_src>
import numpy as np
import jax
import jax.numpy as jnp
from jax.experimental import pallas as pl
from jax.experimental.pallas import tpu as pltpu

LEAKY_ALPHA = 0.2        # Python float -> static literal (never a captured jax array)
NEG_BIG = -9.0e15        # matches -9000000000000000.0 in the PyTorch reference
ACT_PAD = 128            # lane-dense padded width for the action output


# ----------------------------- fused Pallas kernel ---------------------------

def _make_dual_kernel(n_heads, msg, hidden):
    H2 = 2 * hidden            # both channels' hidden, lane-dense
    NH2 = 2 * n_heads          # total heads (channel A heads then channel B heads)
    D2 = NH2 * msg             # total per-head message width

    def kernel(x_ref, adj_ref, enc_w_ref, wext_ref, polw_ref, actw_ref,
               bslab_ref, amask_ref, bsel_ref, bselt_ref, act_ref, h_ref):
        rows = x_ref.shape[0]                       # Bb * N (static)

        b_slab = bslab_ref[...]                     # (3, ACT_PAD) bias slab
        enc_b = b_slab[0:1, :H2]
        pol_b = b_slab[1:2, :H2]
        act_b = b_slab[2:3, :]

        # ---- encoder: both channels fused block-diagonally, Bb*N rows -------
        h0 = jnp.maximum(
            jnp.dot(x_ref[...], enc_w_ref[...],
                    preferred_element_type=jnp.float32) + enc_b, 0.0)   # (Bb*N, 2H)

        # ---- one matmul for every head of both channels ---------------------
        #   y[:, :D2]           per-head Wh   (split sits on the 128-lane boundary)
        #   y[:, D2:D2+NH2]     source logits  Wh . a1   per head
        #   y[:, D2+NH2:]       dest   logits  Wh . a2   per head
        y = jnp.dot(h0, wext_ref[...], preferred_element_type=jnp.float32)
        wh = y[:, :D2]
        e_src = y[:, D2:D2 + NH2]
        e_dst = y[:, D2 + NH2:]

        adjf = adj_ref[...].astype(jnp.float32)     # (Bb*N, N): mask built in-kernel
        amask = amask_ref[...]                      # (Bb*N, Bb*N) block-diag ones
        bsel = bsel_ref[...]                        # (Bb*N, N)   tiled identity
        bselt = bselt_ref[...]                      # (N, Bb*N)   its transpose

        pol_w = polw_ref[...]
        h_pre = jnp.zeros((rows, H2), jnp.float32)

        for idx in range(NH2):                      # A-channel heads, then B-channel
            # dest logits re-laid out along lanes: ed[r, j] = e_dst[batch(r)*N + j]
            ed = jnp.dot(amask, e_dst[:, idx:idx + 1] * bsel,
                         preferred_element_type=jnp.float32)            # (Bb*N, N)
            e = e_src[:, idx:idx + 1] + ed
            e = jnp.where(e > 0, e, LEAKY_ALPHA * e)                    # LeakyReLU
            att = jnp.where(adjf > 0.0, e, NEG_BIG)                     # adjacency mask
            att = att - jnp.max(att, axis=-1, keepdims=True)
            p = jnp.exp(att)
            att = p * pl.reciprocal(jnp.sum(p, axis=-1, keepdims=True),
                                    approx=True)                        # EUP reciprocal

            # block-diagonal embedding of the per-batch (N,N) attention so the
            # weighted sum over neighbours is ONE matmul for the whole block.
            att_bd = jnp.dot(att, bselt,
                             preferred_element_type=jnp.float32) * amask
            hp = jnp.dot(att_bd, wh[:, idx * msg:(idx + 1) * msg],
                         preferred_element_type=jnp.float32)            # (Bb*N, msg)
            # ELU (concat=True); clamp keeps the untaken exp branch finite
            out_k = jnp.where(hp > 0, hp, jnp.exp(jnp.minimum(hp, 0.0)) - 1.0)

            # policy matmul folded per head; block-diagonal pol_w rows mean h_pre
            # accumulates directly as the lane-dense [h_A | h_B] concatenation.
            h_pre = h_pre + jnp.dot(out_k, pol_w[idx * msg:(idx + 1) * msg, :],
                                    preferred_element_type=jnp.float32)

        h = jnp.maximum(h_pre + pol_b, 0.0)                             # (Bb*N, 2H)
        h_ref[...] = h                                                  # single store
        act_ref[...] = (jnp.dot(h, actw_ref[...],
                                preferred_element_type=jnp.float32) + act_b)

    return kernel


# ----------------------------- Pallas wrapper --------------------------------

def dual_channel_forward(params, x, adj, *, block_b=4):
    """Mirrors DualChannelGATAgent.forward -> (action, h). One pallas_call total."""
    B, N, _ = adj.shape
    fused = params["fused"]
    hidden = params["hidden"]
    n_heads = params["n_heads"]
    msg = params["msg"]
    n_actions = params["n_actions"]
    H2 = 2 * hidden
    in_tot = x.shape[-1]

    Bb = max(1, min(block_b, B))
    nb = pl.cdiv(B, Bb)
    B_pad = nb * Bb

    x2 = x                                                   # (B*N, in_tot), batch-major
    adj2 = (adj > 0).astype(jnp.int8).reshape(B * N, N)      # int8: 4x fewer HBM bytes
    if B_pad != B:
        x2 = jnp.pad(x2, ((0, (B_pad - B) * N), (0, 0)))
        adj2 = jnp.pad(adj2, ((0, (B_pad - B) * N), (0, 0)))

    # constant selection matrices for the block-diagonal attention trick
    amask_np = np.kron(np.eye(Bb, dtype=np.float32), np.ones((N, N), np.float32))
    bsel_np = np.tile(np.eye(N, dtype=np.float32), (Bb, 1))
    amask = jnp.asarray(amask_np)              # (Bb*N, Bb*N)
    bsel = jnp.asarray(bsel_np)                # (Bb*N, N)
    bselt = jnp.asarray(bsel_np.T.copy())      # (N, Bb*N)

    weights = [fused["enc_w_bd"], fused["w_ext_bd"], fused["pol_w_bd"],
               fused["act_w_pad"], fused["b_slab"], amask, bsel, bselt]

    def dspec(r, c):                       # per-batch-block 2D data block
        return pl.BlockSpec((r, c), lambda b: (b, 0))

    def wspec(arr):                        # whole-array weight block (fetched once)
        return pl.BlockSpec(arr.shape, lambda b: (0,) * arr.ndim)

    act_out, h_out = pl.pallas_call(
        _make_dual_kernel(n_heads, msg, hidden),
        out_shape=(jax.ShapeDtypeStruct((B_pad * N, ACT_PAD), jnp.float32),
                   jax.ShapeDtypeStruct((B_pad * N, H2), jnp.float32)),
        grid=(nb,),
        in_specs=[dspec(Bb * N, in_tot), dspec(Bb * N, N)]
                + [wspec(w) for w in weights],
        out_specs=(dspec(Bb * N, ACT_PAD), dspec(Bb * N, H2)),
        compiler_params=pltpu.CompilerParams(
            dimension_semantics=("parallel",),            # megacore / 2-TC sharding
            vmem_limit_bytes=32 * 1024 * 1024),           # tiny footprint, safe on v7x
    )(x2, adj2, *weights)

    if B_pad != B:
        act_out = act_out[:B * N]
        h_out = h_out[:B * N]
    return act_out[:, :n_actions], h_out


# ----------------------------- parameters ------------------------------------

def _xavier(key, shape, gain=1.414):
    fan_in, fan_out = shape
    limit = gain * float(np.sqrt(6.0 / (fan_in + fan_out)))
    return jax.random.uniform(key, shape, jnp.float32, -limit, limit)


def make_gat_channel_params(key, in_dim, hidden, msg, n_heads):
    keys = jax.random.split(key, 4 + n_heads)
    p = {
        "enc_w": _xavier(keys[0], (in_dim, hidden), gain=1.0),
        "enc_b": 0.1 * jax.random.normal(keys[1], (1, hidden), jnp.float32),
        "pol_w": _xavier(keys[2], (msg * n_heads, hidden), gain=1.0),
        "pol_b": 0.1 * jax.random.normal(keys[3], (1, hidden), jnp.float32),
        "heads": [],
    }
    for k in range(n_heads):
        kw, ka = jax.random.split(keys[4 + k])
        W = _xavier(kw, (hidden, msg))                 # GraphAttentionLayer.W
        a = _xavier(ka, (2 * msg, 1))                  # GraphAttentionLayer.a
        p["heads"].append((W, a[:msg, 0], a[msg:, 0]))  # (W, a1, a2)
    return p


def fuse_dual_params(ch_a, ch_b, act_w_pad, act_b_pad):
    """Pack both channels into block-diagonal fused-kernel weights (8 tensors)."""
    hidden = ch_a["enc_w"].shape[1]
    n_heads = len(ch_a["heads"])
    msg = ch_a["heads"][0][0].shape[1]
    in_a, in_b = ch_a["enc_w"].shape[0], ch_b["enc_w"].shape[0]
    D = n_heads * msg
    H2, D2, NH2 = 2 * hidden, 2 * D, 2 * n_heads
    assert H2 <= ACT_PAD

    enc_w_bd = jnp.zeros((in_a + in_b, H2), jnp.float32)
    enc_w_bd = enc_w_bd.at[:in_a, :hidden].set(ch_a["enc_w"])
    enc_w_bd = enc_w_bd.at[in_a:, hidden:].set(ch_b["enc_w"])

    w_bd = jnp.zeros((H2, D2), jnp.float32)     # per-head W, block-diag over channels
    wa1_bd = jnp.zeros((H2, NH2), jnp.float32)  # W @ a1 per head (source logits)
    wa2_bd = jnp.zeros((H2, NH2), jnp.float32)  # W @ a2 per head (dest logits)
    pol_w_bd = jnp.zeros((D2, H2), jnp.float32)
    for c, ch in enumerate((ch_a, ch_b)):
        r0, c0 = c * hidden, c * D
        w_all = jnp.concatenate([W for (W, _, _) in ch["heads"]], axis=1)
        w_bd = w_bd.at[r0:r0 + hidden, c0:c0 + D].set(w_all)
        wa1 = jnp.stack([W @ a1 for (W, a1, _) in ch["heads"]], axis=1)
        wa2 = jnp.stack([W @ a2 for (W, _, a2) in ch["heads"]], axis=1)
        wa1_bd = wa1_bd.at[r0:r0 + hidden, c * n_heads:(c + 1) * n_heads].set(wa1)
        wa2_bd = wa2_bd.at[r0:r0 + hidden, c * n_heads:(c + 1) * n_heads].set(wa2)
        pol_w_bd = pol_w_bd.at[c0:c0 + D, r0:r0 + hidden].set(ch["pol_w"])

    # [ per-head W | per-head a1 logits | per-head a2 logits ]
    w_ext_bd = jnp.concatenate([w_bd, wa1_bd, wa2_bd], axis=1)   # (2H, 2D + 4*nh)

    b_slab = jnp.zeros((3, ACT_PAD), jnp.float32)
    b_slab = b_slab.at[0, :hidden].set(ch_a["enc_b"][0]).at[0, hidden:H2].set(ch_b["enc_b"][0])
    b_slab = b_slab.at[1, :hidden].set(ch_a["pol_b"][0]).at[1, hidden:H2].set(ch_b["pol_b"][0])
    b_slab = b_slab.at[2, :].set(act_b_pad[0])

    return {"enc_w_bd": enc_w_bd, "w_ext_bd": w_ext_bd, "pol_w_bd": pol_w_bd,
            "act_w_pad": act_w_pad, "b_slab": b_slab}


def make_dual_channel_params(key, input_shape, capability_shape, hidden, msg,
                             n_heads, n_actions):
    k_a, k_b, k_act, k_actb = jax.random.split(key, 4)
    in_a = input_shape - capability_shape
    ch_a = make_gat_channel_params(k_a, in_a, hidden, msg, n_heads)
    ch_b = make_gat_channel_params(k_b, capability_shape, hidden, msg, n_heads)
    act_w = _xavier(k_act, (2 * hidden, n_actions), gain=1.0)
    act_b = 0.1 * jax.random.normal(k_actb, (1, n_actions), jnp.float32)
    # zero-pad the action head to 128 output lanes for a lane-dense store
    act_w_pad = jnp.zeros((2 * hidden, ACT_PAD), jnp.float32).at[:, :n_actions].set(act_w)
    act_b_pad = jnp.zeros((1, ACT_PAD), jnp.float32).at[:, :n_actions].set(act_b)
    params = {
        "input_shape_a": in_a, "hidden": hidden,
        "n_heads": n_heads, "msg": msg, "n_actions": n_actions,
        "channel_A": ch_a, "channel_B": ch_b,
        "act_w": act_w, "act_b": act_b,
    }
    params["fused"] = fuse_dual_params(ch_a, ch_b, act_w_pad, act_b_pad)
    return params


# ----------------------------- pure-JAX reference ----------------------------

def _ref_gat_channel(p, x, adj):
    B, N, _ = adj.shape
    h0 = jax.nn.relu(x @ p["enc_w"] + p["enc_b"]).reshape(B, N, -1)
    outs = []
    for (W, a1, a2) in p["heads"]:
        Wh = h0 @ W
        e1 = jnp.einsum("bne,e->bn", Wh, a1)
        e2 = jnp.einsum("bne,e->bn", Wh, a2)
        e = e1[:, :, None] + e2[:, None, :]
        e = jnp.where(e > 0, e, LEAKY_ALPHA * e)
        att = jnp.where(adj > 0, e, NEG_BIG)
        att = jax.nn.softmax(att, axis=-1)
        hp = jnp.einsum("bij,bje->bie", att, Wh)
        outs.append(jax.nn.elu(hp))
    xcat = jnp.concatenate(outs, axis=-1).reshape(B * N, -1)
    return jax.nn.relu(xcat @ p["pol_w"] + p["pol_b"])


def _ref_dual(params, x, adj):
    in_a = params["input_shape_a"]
    h_a = _ref_gat_channel(params["channel_A"], x[:, :in_a], adj)
    h_b = _ref_gat_channel(params["channel_B"], x[:, in_a:], adj)
    h = jnp.concatenate([h_a, h_b], axis=-1)
    action = h @ params["act_w"] + params["act_b"]
    return action, h


# ----------------------------- main -------------------------------------------

if __name__ == "__main__":
    B, N = 8, 4                       # batch, number of agents (nodes)
    input_shape = 12                  # per-agent observation size
    capability_shape = 4
    hidden_dim = 32
    msg_hidden_dim = 32
    n_heads = 2
    n_actions = 5

    key = jax.random.PRNGKey(0)
    k_params, k_x, k_adj = jax.random.split(key, 3)

    params = make_dual_channel_params(k_params, input_shape, capability_shape,
                                      hidden_dim, msg_hidden_dim, n_heads,
                                      n_actions)

    x = jax.random.normal(k_x, (B * N, input_shape), jnp.float32)
    adj = (jax.random.uniform(k_adj, (B, N, N)) > 0.5).astype(jnp.float32)
    adj = jnp.maximum(adj, jnp.transpose(adj, (0, 2, 1)))            # symmetric
    adj = jnp.maximum(adj, jnp.eye(N, dtype=jnp.float32)[None])      # self loops

    action, h = dual_channel_forward(params, x, adj, block_b=4)      # grid=(2,)
    action = jax.block_until_ready(action)
    h = jax.block_until_ready(h)

    # correctness vs pure-JAX mirror of the PyTorch semantics (tolerance covers
    # the approx reciprocal and the matmul re-association in the fused kernel)
    ref_action, ref_h = _ref_dual(params, x, adj)
    np.testing.assert_allclose(np.asarray(action), np.asarray(ref_action),
                               rtol=5e-3, atol=5e-3)
    np.testing.assert_allclose(np.asarray(h), np.asarray(ref_h),
                               rtol=5e-3, atol=5e-3)

    assert action.shape == (B * N, n_actions)
    assert h.shape == (B * N, 2 * hidden_dim)
    print("KERNEL_OK")
</pallas_src>

<mosaic_0001>
module attributes {stable_mosaic.version = 11 : i64} {
  func.func @kernel(%arg0: i32, %arg1: memref<16x12xf32, #tpu.memory_space<vmem>>, %arg2: memref<16x4xi8, #tpu.memory_space<vmem>>, %arg3: memref<12x64xf32, #tpu.memory_space<vmem>>, %arg4: memref<64x136xf32, #tpu.memory_space<vmem>>, %arg5: memref<128x64xf32, #tpu.memory_space<vmem>>, %arg6: memref<64x128xf32, #tpu.memory_space<vmem>>, %arg7: memref<3x128xf32, #tpu.memory_space<vmem>>, %arg8: memref<16x16xf32, #tpu.memory_space<vmem>>, %arg9: memref<16x4xf32, #tpu.memory_space<vmem>>, %arg10: memref<4x16xf32, #tpu.memory_space<vmem>>, %arg11: memref<16x128xf32, #tpu.memory_space<vmem>>, %arg12: memref<16x64xf32, #tpu.memory_space<vmem>>) attributes {dimension_semantics = [#tpu.dimension_semantics<parallel>], iteration_bounds = array<i64: 2>, scalar_prefetch = 0 : i64, scratch_operands = 0 : i64, tpu.core_type = #tpu.core_type<tc>, window_params = [{transform_indices = @transform_0, window_bounds = array<i64: 16, 12>}, {transform_indices = @transform_1, window_bounds = array<i64: 16, 4>}, {pipeline_mode = #tpu.pipeline_mode<synchronous>, transform_indices = @transform_2, window_bounds = array<i64: 12, 64>}, {pipeline_mode = #tpu.pipeline_mode<synchronous>, transform_indices = @transform_3, window_bounds = array<i64: 64, 136>}, {pipeline_mode = #tpu.pipeline_mode<synchronous>, transform_indices = @transform_4, window_bounds = array<i64: 128, 64>}, {pipeline_mode = #tpu.pipeline_mode<synchronous>, transform_indices = @transform_5, window_bounds = array<i64: 64, 128>}, {pipeline_mode = #tpu.pipeline_mode<synchronous>, transform_indices = @transform_6, window_bounds = array<i64: 3, 128>}, {pipeline_mode = #tpu.pipeline_mode<synchronous>, transform_indices = @transform_7, window_bounds = array<i64: 16, 16>}, {pipeline_mode = #tpu.pipeline_mode<synchronous>, transform_indices = @transform_8, window_bounds = array<i64: 16, 4>}, {pipeline_mode = #tpu.pipeline_mode<synchronous>, transform_indices = @transform_9, window_bounds = array<i64: 4, 16>}, {transform_indices = @transform_10, window_bounds = array<i64: 16, 128>}, {transform_indices = @transform_11, window_bounds = array<i64: 16, 64>}]} {
    %c0 = arith.constant 0 : index
    %c0_0 = arith.constant 0 : index
    %0 = vector.load %arg7[%c0, %c0_0] : memref<3x128xf32, #tpu.memory_space<vmem>>, vector<3x128xf32>
    %1 = vector.extract_strided_slice %0 {offsets = [0, 0], sizes = [1, 64], strides = [1, 1]} : vector<3x128xf32> to vector<1x64xf32>
    %2 = vector.extract_strided_slice %0 {offsets = [1, 0], sizes = [1, 64], strides = [1, 1]} : vector<3x128xf32> to vector<1x64xf32>
    %3 = vector.extract_strided_slice %0 {offsets = [2, 0], sizes = [1, 128], strides = [1, 1]} : vector<3x128xf32> to vector<1x128xf32>
    %c0_1 = arith.constant 0 : index
    %c0_2 = arith.constant 0 : index
    %4 = vector.load %arg1[%c0_1, %c0_2] : memref<16x12xf32, #tpu.memory_space<vmem>>, vector<16x12xf32>
    %c0_3 = arith.constant 0 : index
    %c0_4 = arith.constant 0 : index
    %5 = vector.load %arg3[%c0_3, %c0_4] : memref<12x64xf32, #tpu.memory_space<vmem>>, vector<12x64xf32>
    %cst = arith.constant dense<0.000000e+00> : vector<16x64xf32>
    %6 = tpu.matmul %4, %5, %cst {dimension_numbers = #tpu.dot_dimension_numbers<[1], [0], [0], [1], [0, 0, 1, 1], [], []>} : vector<16x12xf32>, vector<12x64xf32>, vector<16x64xf32> -> vector<16x64xf32>
    %7 = vector.broadcast %1 : vector<1x64xf32> to vector<16x64xf32>
    %8 = arith.addf %6, %7 : vector<16x64xf32>
    %cst_5 = arith.constant 0.000000e+00 : f32
    %9 = vector.broadcast %cst_5 : f32 to vector<16x64xf32>
    %10 = arith.maximumf %8, %9 : vector<16x64xf32>
    %c0_6 = arith.constant 0 : index
    %c0_7 = arith.constant 0 : index
    %11 = vector.load %arg4[%c0_6, %c0_7] : memref<64x136xf32, #tpu.memory_space<vmem>>, vector<64x136xf32>
    %cst_8 = arith.constant dense<0.000000e+00> : vector<16x136xf32>
    %12 = tpu.matmul %10, %11, %cst_8 {dimension_numbers = #tpu.dot_dimension_numbers<[1], [0], [0], [1], [0, 0, 1, 1], [], []>} : vector<16x64xf32>, vector<64x136xf32>, vector<16x136xf32> -> vector<16x136xf32>
    %13 = vector.extract_strided_slice %12 {offsets = [0, 0], sizes = [16, 128], strides = [1, 1]} : vector<16x136xf32> to vector<16x128xf32>
    %14 = vector.extract_strided_slice %12 {offsets = [0, 128], sizes = [16, 4], strides = [1, 1]} : vector<16x136xf32> to vector<16x4xf32>
    %15 = vector.extract_strided_slice %12 {offsets = [0, 132], sizes = [16, 4], strides = [1, 1]} : vector<16x136xf32> to vector<16x4xf32>
    %c0_9 = arith.constant 0 : index
    %c0_10 = arith.constant 0 : index
    %16 = vector.load %arg2[%c0_9, %c0_10] : memref<16x4xi8, #tpu.memory_space<vmem>>, vector<16x4xi8>
    %17 = arith.sitofp %16 : vector<16x4xi8> to vector<16x4xf32>
    %c0_11 = arith.constant 0 : index
    %c0_12 = arith.constant 0 : index
    %18 = vector.load %arg8[%c0_11, %c0_12] : memref<16x16xf32, #tpu.memory_space<vmem>>, vector<16x16xf32>
    %c0_13 = arith.constant 0 : index
    %c0_14 = arith.constant 0 : index
    %19 = vector.load %arg9[%c0_13, %c0_14] : memref<16x4xf32, #tpu.memory_space<vmem>>, vector<16x4xf32>
    %c0_15 = arith.constant 0 : index
    %c0_16 = arith.constant 0 : index
    %20 = vector.load %arg10[%c0_15, %c0_16] : memref<4x16xf32, #tpu.memory_space<vmem>>, vector<4x16xf32>
    %c0_17 = arith.constant 0 : index
    %c0_18 = arith.constant 0 : index
    %21 = vector.load %arg5[%c0_17, %c0_18] : memref<128x64xf32, #tpu.memory_space<vmem>>, vector<128x64xf32>
    %cst_19 = arith.constant 0.000000e+00 : f32
    %22 = vector.broadcast %cst_19 : f32 to vector<16x64xf32>
    %23 = vector.extract_strided_slice %15 {offsets = [0, 0], sizes = [16, 1], strides = [1, 1]} : vector<16x4xf32> to vector<16x1xf32>
    %24 = vector.broadcast %23 : vector<16x1xf32> to vector<16x4xf32>
    %25 = arith.mulf %24, %19 : vector<16x4xf32>
    %cst_20 = arith.constant dense<0.000000e+00> : vector<16x4xf32>
    %26 = tpu.matmul %18, %25, %cst_20 {dimension_numbers = #tpu.dot_dimension_numbers<[1], [0], [0], [1], [0, 0, 1, 1], [], []>} : vector<16x16xf32>, vector<16x4xf32>, vector<16x4xf32> -> vector<16x4xf32>
    %27 = vector.extract_strided_slice %14 {offsets = [0, 0], sizes = [16, 1], strides = [1, 1]} : vector<16x4xf32> to vector<16x1xf32>
    %28 = vector.broadcast %27 : vector<16x1xf32> to vector<16x4xf32>
    %29 = arith.addf %28, %26 : vector<16x4xf32>
    %cst_21 = arith.constant 0.000000e+00 : f32
    %30 = vector.broadcast %cst_21 : f32 to vector<16x4xf32>
    %31 = arith.cmpf ogt, %29, %30 : vector<16x4xf32>
    %cst_22 = arith.constant 2.000000e-01 : f32
    %32 = vector.broadcast %cst_22 : f32 to vector<16x4xf32>
    %33 = arith.mulf %32, %29 : vector<16x4xf32>
    %34 = arith.select %31, %29, %33 : vector<16x4xi1>, vector<16x4xf32>
    %cst_23 = arith.constant 0.000000e+00 : f32
    %35 = vector.broadcast %cst_23 : f32 to vector<16x4xf32>
    %36 = arith.cmpf ogt, %17, %35 : vector<16x4xf32>
    %cst_24 = arith.constant -9.000000e+15 : f32
    %37 = vector.broadcast %cst_24 : f32 to vector<16x4xf32>
    %38 = arith.select %36, %34, %37 : vector<16x4xi1>, vector<16x4xf32>
    %cst_25 = arith.constant dense<0xFF800000> : vector<16xf32>
    %39 = vector.multi_reduction <maximumf>, %38, %cst_25 [1] : vector<16x4xf32> to vector<16xf32>
    %40 = vector.shape_cast %39 : vector<16xf32> to vector<16x1xf32>
    %41 = vector.broadcast %40 : vector<16x1xf32> to vector<16x4xf32>
    %42 = arith.subf %38, %41 : vector<16x4xf32>
    %43 = math.exp %42 : vector<16x4xf32>
    %cst_26 = arith.constant dense<0.000000e+00> : vector<16xf32>
    %44 = vector.multi_reduction <add>, %43, %cst_26 [1] : vector<16x4xf32> to vector<16xf32>
    %45 = vector.shape_cast %44 : vector<16xf32> to vector<16x1xf32>
    %46 = tpu.reciprocal %45 {approx = true} : vector<16x1xf32> -> vector<16x1xf32>
    %47 = vector.broadcast %46 : vector<16x1xf32> to vector<16x4xf32>
    %48 = arith.mulf %43, %47 : vector<16x4xf32>
    %cst_27 = arith.constant dense<0.000000e+00> : vector<16x16xf32>
    %49 = tpu.matmul %48, %20, %cst_27 {dimension_numbers = #tpu.dot_dimension_numbers<[1], [0], [0], [1], [0, 0, 1, 1], [], []>} : vector<16x4xf32>, vector<4x16xf32>, vector<16x16xf32> -> vector<16x16xf32>
    %50 = arith.mulf %49, %18 : vector<16x16xf32>
    %51 = vector.extract_strided_slice %13 {offsets = [0, 0], sizes = [16, 32], strides = [1, 1]} : vector<16x128xf32> to vector<16x32xf32>
    %cst_28 = arith.constant dense<0.000000e+00> : vector<16x32xf32>
    %52 = tpu.matmul %50, %51, %cst_28 {dimension_numbers = #tpu.dot_dimension_numbers<[1], [0], [0], [1], [0, 0, 1, 1], [], []>} : vector<16x16xf32>, vector<16x32xf32>, vector<16x32xf32> -> vector<16x32xf32>
    %cst_29 = arith.constant 0.000000e+00 : f32
    %53 = vector.broadcast %cst_29 : f32 to vector<16x32xf32>
    %54 = arith.cmpf ogt, %52, %53 : vector<16x32xf32>
    %cst_30 = arith.constant 0.000000e+00 : f32
    %55 = vector.broadcast %cst_30 : f32 to vector<16x32xf32>
    %56 = arith.minimumf %52, %55 : vector<16x32xf32>
    %57 = math.exp %56 : vector<16x32xf32>
    %cst_31 = arith.constant 1.000000e+00 : f32
    %58 = vector.broadcast %cst_31 : f32 to vector<16x32xf32>
    %59 = arith.subf %57, %58 : vector<16x32xf32>
    %60 = arith.select %54, %52, %59 : vector<16x32xi1>, vector<16x32xf32>
    %61 = vector.extract_strided_slice %21 {offsets = [0, 0], sizes = [32, 64], strides = [1, 1]} : vector<128x64xf32> to vector<32x64xf32>
    %cst_32 = arith.constant dense<0.000000e+00> : vector<16x64xf32>
    %62 = tpu.matmul %60, %61, %cst_32 {dimension_numbers = #tpu.dot_dimension_numbers<[1], [0], [0], [1], [0, 0, 1, 1], [], []>} : vector<16x32xf32>, vector<32x64xf32>, vector<16x64xf32> -> vector<16x64xf32>
    %63 = arith.addf %22, %62 : vector<16x64xf32>
    %64 = vector.extract_strided_slice %15 {offsets = [0, 1], sizes = [16, 1], strides = [1, 1]} : vector<16x4xf32> to vector<16x1xf32>
    %65 = vector.broadcast %64 : vector<16x1xf32> to vector<16x4xf32>
    %66 = arith.mulf %65, %19 : vector<16x4xf32>
    %cst_33 = arith.constant dense<0.000000e+00> : vector<16x4xf32>
    %67 = tpu.matmul %18, %66, %cst_33 {dimension_numbers = #tpu.dot_dimension_numbers<[1], [0], [0], [1], [0, 0, 1, 1], [], []>} : vector<16x16xf32>, vector<16x4xf32>, vector<16x4xf32> -> vector<16x4xf32>
    %68 = vector.extract_strided_slice %14 {offsets = [0, 1], sizes = [16, 1], strides = [1, 1]} : vector<16x4xf32> to vector<16x1xf32>
    %69 = vector.broadcast %68 : vector<16x1xf32> to vector<16x4xf32>
    %70 = arith.addf %69, %67 : vector<16x4xf32>
    %cst_34 = arith.constant 0.000000e+00 : f32
    %71 = vector.broadcast %cst_34 : f32 to vector<16x4xf32>
    %72 = arith.cmpf ogt, %70, %71 : vector<16x4xf32>
    %cst_35 = arith.constant 2.000000e-01 : f32
    %73 = vector.broadcast %cst_35 : f32 to vector<16x4xf32>
    %74 = arith.mulf %73, %70 : vector<16x4xf32>
    %75 = arith.select %72, %70, %74 : vector<16x4xi1>, vector<16x4xf32>
    %cst_36 = arith.constant 0.000000e+00 : f32
    %76 = vector.broadcast %cst_36 : f32 to vector<16x4xf32>
    %77 = arith.cmpf ogt, %17, %76 : vector<16x4xf32>
    %cst_37 = arith.constant -9.000000e+15 : f32
    %78 = vector.broadcast %cst_37 : f32 to vector<16x4xf32>
    %79 = arith.select %77, %75, %78 : vector<16x4xi1>, vector<16x4xf32>
    %cst_38 = arith.constant dense<0xFF800000> : vector<16xf32>
    %80 = vector.multi_reduction <maximumf>, %79, %cst_38 [1] : vector<16x4xf32> to vector<16xf32>
    %81 = vector.shape_cast %80 : vector<16xf32> to vector<16x1xf32>
    %82 = vector.broadcast %81 : vector<16x1xf32> to vector<16x4xf32>
    %83 = arith.subf %79, %82 : vector<16x4xf32>
    %84 = math.exp %83 : vector<16x4xf32>
    %cst_39 = arith.constant dense<0.000000e+00> : vector<16xf32>
    %85 = vector.multi_reduction <add>, %84, %cst_39 [1] : vector<16x4xf32> to vector<16xf32>
    %86 = vector.shape_cast %85 : vector<16xf32> to vector<16x1xf32>
    %87 = tpu.reciprocal %86 {approx = true} : vector<16x1xf32> -> vector<16x1xf32>
    %88 = vector.broadcast %87 : vector<16x1xf32> to vector<16x4xf32>
    %89 = arith.mulf %84, %88 : vector<16x4xf32>
    %cst_40 = arith.constant dense<0.000000e+00> : vector<16x16xf32>
    %90 = tpu.matmul %89, %20, %cst_40 {dimension_numbers = #tpu.dot_dimension_numbers<[1], [0], [0], [1], [0, 0, 1, 1], [], []>} : vector<16x4xf32>, vector<4x16xf32>, vector<16x16xf32> -> vector<16x16xf32>
    %91 = arith.mulf %90, %18 : vector<16x16xf32>
    %92 = vector.extract_strided_slice %13 {offsets = [0, 32], sizes = [16, 32], strides = [1, 1]} : vector<16x128xf32> to vector<16x32xf32>
    %cst_41 = arith.constant dense<0.000000e+00> : vector<16x32xf32>
    %93 = tpu.matmul %91, %92, %cst_41 {dimension_numbers = #tpu.dot_dimension_numbers<[1], [0], [0], [1], [0, 0, 1, 1], [], []>} : vector<16x16xf32>, vector<16x32xf32>, vector<16x32xf32> -> vector<16x32xf32>
    %cst_42 = arith.constant 0.000000e+00 : f32
    %94 = vector.broadcast %cst_42 : f32 to vector<16x32xf32>
    %95 = arith.cmpf ogt, %93, %94 : vector<16x32xf32>
    %cst_43 = arith.constant 0.000000e+00 : f32
    %96 = vector.broadcast %cst_43 : f32 to vector<16x32xf32>
    %97 = arith.minimumf %93, %96 : vector<16x32xf32>
    %98 = math.exp %97 : vector<16x32xf32>
    %cst_44 = arith.constant 1.000000e+00 : f32
    %99 = vector.broadcast %cst_44 : f32 to vector<16x32xf32>
    %100 = arith.subf %98, %99 : vector<16x32xf32>
    %101 = arith.select %95, %93, %100 : vector<16x32xi1>, vector<16x32xf32>
    %102 = vector.extract_strided_slice %21 {offsets = [32, 0], sizes = [32, 64], strides = [1, 1]} : vector<128x64xf32> to vector<32x64xf32>
    %cst_45 = arith.constant dense<0.000000e+00> : vector<16x64xf32>
    %103 = tpu.matmul %101, %102, %cst_45 {dimension_numbers = #tpu.dot_dimension_numbers<[1], [0], [0], [1], [0, 0, 1, 1], [], []>} : vector<16x32xf32>, vector<32x64xf32>, vector<16x64xf32> -> vector<16x64xf32>
    %104 = arith.addf %63, %103 : vector<16x64xf32>
    %105 = vector.extract_strided_slice %15 {offsets = [0, 2], sizes = [16, 1], strides = [1, 1]} : vector<16x4xf32> to vector<16x1xf32>
    %106 = vector.broadcast %105 : vector<16x1xf32> to vector<16x4xf32>
    %107 = arith.mulf %106, %19 : vector<16x4xf32>
    %cst_46 = arith.constant dense<0.000000e+00> : vector<16x4xf32>
    %108 = tpu.matmul %18, %107, %cst_46 {dimension_numbers = #tpu.dot_dimension_numbers<[1], [0], [0], [1], [0, 0, 1, 1], [], []>} : vector<16x16xf32>, vector<16x4xf32>, vector<16x4xf32> -> vector<16x4xf32>
    %109 = vector.extract_strided_slice %14 {offsets = [0, 2], sizes = [16, 1], strides = [1, 1]} : vector<16x4xf32> to vector<16x1xf32>
    %110 = vector.broadcast %109 : vector<16x1xf32> to vector<16x4xf32>
    %111 = arith.addf %110, %108 : vector<16x4xf32>
    %cst_47 = arith.constant 0.000000e+00 : f32
    %112 = vector.broadcast %cst_47 : f32 to vector<16x4xf32>
    %113 = arith.cmpf ogt, %111, %112 : vector<16x4xf32>
    %cst_48 = arith.constant 2.000000e-01 : f32
    %114 = vector.broadcast %cst_48 : f32 to vector<16x4xf32>
    %115 = arith.mulf %114, %111 : vector<16x4xf32>
    %116 = arith.select %113, %111, %115 : vector<16x4xi1>, vector<16x4xf32>
    %cst_49 = arith.constant 0.000000e+00 : f32
    %117 = vector.broadcast %cst_49 : f32 to vector<16x4xf32>
    %118 = arith.cmpf ogt, %17, %117 : vector<16x4xf32>
    %cst_50 = arith.constant -9.000000e+15 : f32
    %119 = vector.broadcast %cst_50 : f32 to vector<16x4xf32>
    %120 = arith.select %118, %116, %119 : vector<16x4xi1>, vector<16x4xf32>
    %cst_51 = arith.constant dense<0xFF800000> : vector<16xf32>
    %121 = vector.multi_reduction <maximumf>, %120, %cst_51 [1] : vector<16x4xf32> to vector<16xf32>
    %122 = vector.shape_cast %121 : vector<16xf32> to vector<16x1xf32>
    %123 = vector.broadcast %122 : vector<16x1xf32> to vector<16x4xf32>
    %124 = arith.subf %120, %123 : vector<16x4xf32>
    %125 = math.exp %124 : vector<16x4xf32>
    %cst_52 = arith.constant dense<0.000000e+00> : vector<16xf32>
    %126 = vector.multi_reduction <add>, %125, %cst_52 [1] : vector<16x4xf32> to vector<16xf32>
    %127 = vector.shape_cast %126 : vector<16xf32> to vector<16x1xf32>
    %128 = tpu.reciprocal %127 {approx = true} : vector<16x1xf32> -> vector<16x1xf32>
    %129 = vector.broadcast %128 : vector<16x1xf32> to vector<16x4xf32>
    %130 = arith.mulf %125, %129 : vector<16x4xf32>
    %cst_53 = arith.constant dense<0.000000e+00> : vector<16x16xf32>
    %131 = tpu.matmul %130, %20, %cst_53 {dimension_numbers = #tpu.dot_dimension_numbers<[1], [0], [0], [1], [0, 0, 1, 1], [], []>} : vector<16x4xf32>, vector<4x16xf32>, vector<16x16xf32> -> vector<16x16xf32>
    %132 = arith.mulf %131, %18 : vector<16x16xf32>
    %133 = vector.extract_strided_slice %13 {offsets = [0, 64], sizes = [16, 32], strides = [1, 1]} : vector<16x128xf32> to vector<16x32xf32>
    %cst_54 = arith.constant dense<0.000000e+00> : vector<16x32xf32>
    %134 = tpu.matmul %132, %133, %cst_54 {dimension_numbers = #tpu.dot_dimension_numbers<[1], [0], [0], [1], [0, 0, 1, 1], [], []>} : vector<16x16xf32>, vector<16x32xf32>, vector<16x32xf32> -> vector<16x32xf32>
    %cst_55 = arith.constant 0.000000e+00 : f32
    %135 = vector.broadcast %cst_55 : f32 to vector<16x32xf32>
    %136 = arith.cmpf ogt, %134, %135 : vector<16x32xf32>
    %cst_56 = arith.constant 0.000000e+00 : f32
    %137 = vector.broadcast %cst_56 : f32 to vector<16x32xf32>
    %138 = arith.minimumf %134, %137 : vector<16x32xf32>
    %139 = math.exp %138 : vector<16x32xf32>
    %cst_57 = arith.constant 1.000000e+00 : f32
    %140 = vector.broadcast %cst_57 : f32 to vector<16x32xf32>
    %141 = arith.subf %139, %140 : vector<16x32xf32>
    %142 = arith.select %136, %134, %141 : vector<16x32xi1>, vector<16x32xf32>
    %143 = vector.extract_strided_slice %21 {offsets = [64, 0], sizes = [32, 64], strides = [1, 1]} : vector<128x64xf32> to vector<32x64xf32>
    %cst_58 = arith.constant dense<0.000000e+00> : vector<16x64xf32>
    %144 = tpu.matmul %142, %143, %cst_58 {dimension_numbers = #tpu.dot_dimension_numbers<[1], [0], [0], [1], [0, 0, 1, 1], [], []>} : vector<16x32xf32>, vector<32x64xf32>, vector<16x64xf32> -> vector<16x64xf32>
    %145 = arith.addf %104, %144 : vector<16x64xf32>
    %146 = vector.extract_strided_slice %15 {offsets = [0, 3], sizes = [16, 1], strides = [1, 1]} : vector<16x4xf32> to vector<16x1xf32>
    %147 = vector.broadcast %146 : vector<16x1xf32> to vector<16x4xf32>
    %148 = arith.mulf %147, %19 : vector<16x4xf32>
    %cst_59 = arith.constant dense<0.000000e+00> : vector<16x4xf32>
    %149 = tpu.matmul %18, %148, %cst_59 {dimension_numbers = #tpu.dot_dimension_numbers<[1], [0], [0], [1], [0, 0, 1, 1], [], []>} : vector<16x16xf32>, vector<16x4xf32>, vector<16x4xf32> -> vector<16x4xf32>
    %150 = vector.extract_strided_slice %14 {offsets = [0, 3], sizes = [16, 1], strides = [1, 1]} : vector<16x4xf32> to vector<16x1xf32>
    %151 = vector.broadcast %150 : vector<16x1xf32> to vector<16x4xf32>
    %152 = arith.addf %151, %149 : vector<16x4xf32>
    %cst_60 = arith.constant 0.000000e+00 : f32
    %153 = vector.broadcast %cst_60 : f32 to vector<16x4xf32>
    %154 = arith.cmpf ogt, %152, %153 : vector<16x4xf32>
    %cst_61 = arith.constant 2.000000e-01 : f32
    %155 = vector.broadcast %cst_61 : f32 to vector<16x4xf32>
    %156 = arith.mulf %155, %152 : vector<16x4xf32>
    %157 = arith.select %154, %152, %156 : vector<16x4xi1>, vector<16x4xf32>
    %cst_62 = arith.constant 0.000000e+00 : f32
    %158 = vector.broadcast %cst_62 : f32 to vector<16x4xf32>
    %159 = arith.cmpf ogt, %17, %158 : vector<16x4xf32>
    %cst_63 = arith.constant -9.000000e+15 : f32
    %160 = vector.broadcast %cst_63 : f32 to vector<16x4xf32>
    %161 = arith.select %159, %157, %160 : vector<16x4xi1>, vector<16x4xf32>
    %cst_64 = arith.constant dense<0xFF800000> : vector<16xf32>
    %162 = vector.multi_reduction <maximumf>, %161, %cst_64 [1] : vector<16x4xf32> to vector<16xf32>
    %163 = vector.shape_cast %162 : vector<16xf32> to vector<16x1xf32>
    %164 = vector.broadcast %163 : vector<16x1xf32> to vector<16x4xf32>
    %165 = arith.subf %161, %164 : vector<16x4xf32>
    %166 = math.exp %165 : vector<16x4xf32>
    %cst_65 = arith.constant dense<0.000000e+00> : vector<16xf32>
    %167 = vector.multi_reduction <add>, %166, %cst_65 [1] : vector<16x4xf32> to vector<16xf32>
    %168 = vector.shape_cast %167 : vector<16xf32> to vector<16x1xf32>
    %169 = tpu.reciprocal %168 {approx = true} : vector<16x1xf32> -> vector<16x1xf32>
    %170 = vector.broadcast %169 : vector<16x1xf32> to vector<16x4xf32>
    %171 = arith.mulf %166, %170 : vector<16x4xf32>
    %cst_66 = arith.constant dense<0.000000e+00> : vector<16x16xf32>
    %172 = tpu.matmul %171, %20, %cst_66 {dimension_numbers = #tpu.dot_dimension_numbers<[1], [0], [0], [1], [0, 0, 1, 1], [], []>} : vector<16x4xf32>, vector<4x16xf32>, vector<16x16xf32> -> vector<16x16xf32>
    %173 = arith.mulf %172, %18 : vector<16x16xf32>
    %174 = vector.extract_strided_slice %13 {offsets = [0, 96], sizes = [16, 32], strides = [1, 1]} : vector<16x128xf32> to vector<16x32xf32>
    %cst_67 = arith.constant dense<0.000000e+00> : vector<16x32xf32>
    %175 = tpu.matmul %173, %174, %cst_67 {dimension_numbers = #tpu.dot_dimension_numbers<[1], [0], [0], [1], [0, 0, 1, 1], [], []>} : vector<16x16xf32>, vector<16x32xf32>, vector<16x32xf32> -> vector<16x32xf32>
    %cst_68 = arith.constant 0.000000e+00 : f32
    %176 = vector.broadcast %cst_68 : f32 to vector<16x32xf32>
    %177 = arith.cmpf ogt, %175, %176 : vector<16x32xf32>
    %cst_69 = arith.constant 0.000000e+00 : f32
    %178 = vector.broadcast %cst_69 : f32 to vector<16x32xf32>
    %179 = arith.minimumf %175, %178 : vector<16x32xf32>
    %180 = math.exp %179 : vector<16x32xf32>
    %cst_70 = arith.constant 1.000000e+00 : f32
    %181 = vector.broadcast %cst_70 : f32 to vector<16x32xf32>
    %182 = arith.subf %180, %181 : vector<16x32xf32>
    %183 = arith.select %177, %175, %182 : vector<16x32xi1>, vector<16x32xf32>
    %184 = vector.extract_strided_slice %21 {offsets = [96, 0], sizes = [32, 64], strides = [1, 1]} : vector<128x64xf32> to vector<32x64xf32>
    %cst_71 = arith.constant dense<0.000000e+00> : vector<16x64xf32>
    %185 = tpu.matmul %183, %184, %cst_71 {dimension_numbers = #tpu.dot_dimension_numbers<[1], [0], [0], [1], [0, 0, 1, 1], [], []>} : vector<16x32xf32>, vector<32x64xf32>, vector<16x64xf32> -> vector<16x64xf32>
    %186 = arith.addf %145, %185 : vector<16x64xf32>
    %187 = vector.broadcast %2 : vector<1x64xf32> to vector<16x64xf32>
    %188 = arith.addf %186, %187 : vector<16x64xf32>
    %cst_72 = arith.constant 0.000000e+00 : f32
    %189 = vector.broadcast %cst_72 : f32 to vector<16x64xf32>
    %190 = arith.maximumf %188, %189 : vector<16x64xf32>
    %c0_73 = arith.constant 0 : index
    %c0_74 = arith.constant 0 : index
    %191 = vector.load %arg12[%c0_73, %c0_74] : memref<16x64xf32, #tpu.memory_space<vmem>>, vector<16x64xf32>
    tpu.vector_store %arg12[%c0_73, %c0_74], %190 {strides = array<i32>} : memref<16x64xf32, #tpu.memory_space<vmem>>, vector<16x64xf32>,
    %c0_75 = arith.constant 0 : index
    %c0_76 = arith.constant 0 : index
    %192 = vector.load %arg6[%c0_75, %c0_76] : memref<64x128xf32, #tpu.memory_space<vmem>>, vector<64x128xf32>
    %cst_77 = arith.constant dense<0.000000e+00> : vector<16x128xf32>
    %193 = tpu.matmul %190, %192, %cst_77 {dimension_numbers = #tpu.dot_dimension_numbers<[1], [0], [0], [1], [0, 0, 1, 1], [], []>} : vector<16x64xf32>, vector<64x128xf32>, vector<16x128xf32> -> vector<16x128xf32>
    %194 = vector.broadcast %3 : vector<1x128xf32> to vector<16x128xf32>
    %195 = arith.addf %193, %194 : vector<16x128xf32>
    %c0_78 = arith.constant 0 : index
    %c0_79 = arith.constant 0 : index
    %196 = vector.load %arg11[%c0_78, %c0_79] : memref<16x128xf32, #tpu.memory_space<vmem>>, vector<16x128xf32>
    tpu.vector_store %arg11[%c0_78, %c0_79], %195 {strides = array<i32>} : memref<16x128xf32, #tpu.memory_space<vmem>>, vector<16x128xf32>,
    return
  }
  func.func @transform_0(%arg0: i32) -> (i32, i32) {
    %c0_i32 = arith.constant 0 : i32
    %c0_i32_0 = arith.constant 0 : i32
    return %arg0, %c0_i32 : i32, i32
  }
  func.func @transform_1(%arg0: i32) -> (i32, i32) {
    %c0_i32 = arith.constant 0 : i32
    %c0_i32_0 = arith.constant 0 : i32
    return %arg0, %c0_i32 : i32, i32
  }
  func.func @transform_2(%arg0: i32) -> (i32, i32) {
    %c0_i32 = arith.constant 0 : i32
    %c0_i32_0 = arith.constant 0 : i32
    %c0_i32_1 = arith.constant 0 : i32
    return %c0_i32, %c0_i32_0 : i32, i32
  }
  func.func @transform_3(%arg0: i32) -> (i32, i32) {
    %c0_i32 = arith.constant 0 : i32
    %c0_i32_0 = arith.constant 0 : i32
    %c0_i32_1 = arith.constant 0 : i32
    return %c0_i32, %c0_i32_0 : i32, i32
  }
  func.func @transform_4(%arg0: i32) -> (i32, i32) {
    %c0_i32 = arith.constant 0 : i32
    %c0_i32_0 = arith.constant 0 : i32
    %c0_i32_1 = arith.constant 0 : i32
    return %c0_i32, %c0_i32_0 : i32, i32
  }
  func.func @transform_5(%arg0: i32) -> (i32, i32) {
    %c0_i32 = arith.constant 0 : i32
    %c0_i32_0 = arith.constant 0 : i32
    %c0_i32_1 = arith.constant 0 : i32
    return %c0_i32, %c0_i32_0 : i32, i32
  }
  func.func @transform_6(%arg0: i32) -> (i32, i32) {
    %c0_i32 = arith.constant 0 : i32
    %c0_i32_0 = arith.constant 0 : i32
    %c0_i32_1 = arith.constant 0 : i32
    return %c0_i32, %c0_i32_0 : i32, i32
  }
  func.func @transform_7(%arg0: i32) -> (i32, i32) {
    %c0_i32 = arith.constant 0 : i32
    %c0_i32_0 = arith.constant 0 : i32
    %c0_i32_1 = arith.constant 0 : i32
    return %c0_i32, %c0_i32_0 : i32, i32
  }
  func.func @transform_8(%arg0: i32) -> (i32, i32) {
    %c0_i32 = arith.constant 0 : i32
    %c0_i32_0 = arith.constant 0 : i32
    %c0_i32_1 = arith.constant 0 : i32
    return %c0_i32, %c0_i32_0 : i32, i32
  }
  func.func @transform_9(%arg0: i32) -> (i32, i32) {
    %c0_i32 = arith.constant 0 : i32
    %c0_i32_0 = arith.constant 0 : i32
    %c0_i32_1 = arith.constant 0 : i32
    return %c0_i32, %c0_i32_0 : i32, i32
  }
  func.func @transform_10(%arg0: i32) -> (i32, i32) {
    %c0_i32 = arith.constant 0 : i32
    %c0_i32_0 = arith.constant 0 : i32
    return %arg0, %c0_i32 : i32, i32
  }
  func.func @transform_11(%arg0: i32) -> (i32, i32) {
    %c0_i32 = arith.constant 0 : i32
    %c0_i32_0 = arith.constant 0 : i32
    return %arg0, %c0_i32 : i32, i32
  }
}

</mosaic_0001>

<bundles_post_ra>
// kernel: tpu_custom_call.1
= control target key start
LH: loop header
LB: loop body
LE: loop exit
PB: predicated region body
PF: predicated region fallthrough
CT: control target
= control target key end

     0   :  { %s3624_s0 = inlined_call_operand.vmem [shape: f32[32,12], index: 0, kind: input, shape index: {}]   ;;  %s3625_s1 = inlined_call_operand.vmem [shape: s8[32,4], index: 1, kind: input, shape index: {}]   ;;  %s3626_s2 = inlined_call_operand.vmem [shape: f32[12,64], index: 2, kind: input, shape index: {}]   ;;  %s3627_s3 = inlined_call_operand.vmem [shape: f32[64,136], index: 3, kind: input, shape index: {}]   ;;  %s3628_s4 = inlined_call_operand.vmem [shape: f32[128,64], index: 4, kind: input, shape index: {}]   ;;  %s3629_s5 = inlined_call_operand.vmem [shape: f32[64,128], index: 5, kind: input, shape index: {}]   ;;  %s3630_s6 = inlined_call_operand.vmem [shape: f32[3,128], index: 6, kind: input, shape index: {}]   ;;  %s3631_s7 = inlined_call_operand.hbm [shape: f32[16,16], index: 7, kind: input, shape index: {}]   ;;  %s3632_s8 = inlined_call_operand.vmem [shape: f32[16,4], index: 8, kind: input, shape index: {}]   ;;  %s3633_s9 = inlined_call_operand.vmem [shape: f32[4,16], index: 9, kind: input, shape index: {}]   ;;  %s3634_s10 = inlined_call_operand.hbm [shape: f32[32,128], index: 10, kind: output, shape index: {0}]   ;;  %s3635_s11 = inlined_call_operand.hbm [shape: f32[32,64], index: 11, kind: output, shape index: {1}]  }
   0x1   :  { %3640 = sst [smem:[#allocation11_spill]] %s3624_s0 }
   0x2   :  { %3641 = sst [smem:[#allocation12_spill]] %s3631_s7 }
   0x3   :  { %17 = vsyncpa [#allocation3], 0 }
   0x4   :  { %18 = vsyncpa [#allocation4], 0 }
   0x5   :  { %20 = vsyncpa [#allocation4 + $0x1], 0 }
   0x6   :  { %21 = vsyncpa [#allocation7], 0 }
   0x7   :  { %23 = vsyncpa [#allocation7 + $0x1], 0  ;;  %s3124_s17 = smov 0   ;;  %s3126_s18 = smov 0  }
   0x8   :  { %s3128_s19 = smov 0   ;;  %s3130_s20 = smov 0  }
   0x9 LB: > { %s3145_s21 = sadd.s32 4294967295, %s3043_s20   ;;  %s2487_s22 = sadd.s32 4294967294, %s3043_s20   ;;  %s3043_s20 = sphi %s3130_s20, %s3656_s20   ;;  %s3039_s19 = sphi %s3128_s19, %s3655_s19   ;;  %s3035_s18 = sphi %s3126_s18, %s3654_s18   ;;  %s3031_s17 = sphi %s3124_s17, %s3653_s17  }
   0xa   : > { %s3149_s23 = sadd.s32 1, %s3043_s20   ;;  %s256_s24 = sadd.s32 1, %s3039_s19 }
   0xb   : > { %s253_s25 = ssub.s32 %s3043_s20, %s3149_s23  ;;  %p266_p0 = scmp.ne.s32.totalorder %s3039_s19, %s3035_s18 }
   0xc   : > { %p254_p1 = scmp.eq.s32.totalorder %s253_s25, 0  ;;  %p267_p2 = scmp.eq.s32.totalorder %s3145_s21, 1 }
   0xd   : > { %p272_p3 = scmp.ne.s32.totalorder %s3035_s18, %s3031_s17  ;;  %p273_p4 = scmp.eq.s32.totalorder %s2487_s22, 1 }
   0xe   : > { %s3160_s26 = scalar_select %p254_p1, %s3039_s19, %s256_s24  }
   0xf   : > { %p3162_p5 = por %p267_p2, %p266_p0  ;;  %p3166_p6 = por %p273_p4, %p272_p3 }
  0x10   : > { %p2488_p7 = scmp.ge.s32.totalorder %s3043_s20, 1  ;;  %p306_p8 = scmp.lt.s32.totalorder %s3043_s20, 3 }
  0x11   : > { %s3643_s28 = scalar_select %p3166_p6, 1, 0 }
  0x12   : > { %p2811_p9 = scmp.eq.s32.totalorder %s3145_s21, 0  ;;  %p3173_p10 = pnand %p2488_p7, %p306_p8 }
  0x13   : > { %s3045_s30 = smov [#allocation2]  }
  0x14   : > { %s333_s12 = sshll.u32 %s3045_s30, 4  ;;  %p2800_p11 = pneg %p3173_p10  ;;  %s334_s12 = int_to_ptr.vmem [resolvable:$true] %s333_s12 }
  0x15   : > { %s2934_s13 = scalar_lea.vmem %s334_s12, 256  ;;  %p2942_p3 = scmp.lt.s32.totalorder %s334_s12, %s334_s12 }
  0x16   : > { %p2801_p12 = pnand %p2811_p9, %p2800_p11  ;;  %p2935_p0 = scmp.ne.s32.totalorder %s334_s12, %s2934_s13 }
  0x17   : > { %p2943_p4 = scmp.lt.s32.totalorder %s2934_s13, %s2934_s13 }
  0x18   : > { %p2925_p13 = pneg %p2801_p12 }
  0x19   : > { %p2944_p6 = por %p2943_p4, %p2942_p3 }
  0x1a   : > { %p2937_p1 = pnand %p2935_p0, %p2925_p13 }
  0x1c   : > { %p2938_p2 = pneg %p2937_p1 }
  0x1e   : > { %p2945_p7 = pnand %p2944_p6, %p2938_p2 }
  0x20   : > { %2948 = shalt.err (!%p2945_p7)
}
  0x21   : > { %s3046_s14 = smov 128   ;;  %s3047_s15 = smov 8  }
  0x22   : > { %s3645_s7 = sld [smem:[#allocation12_spill]] }
  0x24   : > { %373 = sbr.rel (%p3173_p10) target bundleno = 4300 (0x10cc), region = 60 }
  0x28   : > { %2803 = dma.hbm_to_vmem [thread:$0]  (!%p2801_p12), %s3645_s7, 256, %s334_s12, [#allocation3], %s3046_s14, %s3046_s14, %s3047_s15  }
  0x29   : > { %3018 = dma.done.wait (%p2811_p9), [#allocation3], 256  }
  0x2a   : > { %3020 = vsyncadd (%p2811_p9), [#allocation3], 4294967040  ;;  %s2495_s24 = sshll.u32 %s3145_s21, 1  ;;  %vm453_vm0 = vcmask 1043456   ;;  %vm446_vm1 = vcmask 97280   ;;  %s3646_s0 = sld [smem:[#allocation11_spill]]  ;;  %v442_v21 = vlaneseq }
  0x2b   : > { %p424_p8 = scmp.lt.s32.totalorder %s2495_s24, 3  ;;  %v441_v0 = vld [vmem:[%s3626_s2 + $0x8] sm:$0xf]  ;;  %v440_v1 = vld [vmem:[%s3626_s2] sm:$0xff]  ;;  %v549_v4 = vld [vmem:[%s3627_s3 + $0x78] sm:$0xff]  ;;  %v3048_v20 = vmov 0.0  }
  0x2c   : > { %2646 = vmatprep.subr.msk.mxu0 %vm453_vm0, %v441_v0  ;;  %573 = vmatprep.subr.mxu1 %v549_v4  ;;  %v548_v5 = vld [vmem:[%s3627_s3 + $0x70] sm:$0xff]  ;;  %v547_v6 = vld [vmem:[%s3627_s3 + $0x68] sm:$0xff]  ;;  %v546_v7 = vld [vmem:[%s3627_s3 + $0x60] sm:$0xff]  ;;  %v3255_v22 = vshrl.u32 %v442_v21, 7  ;;  %vm550_vm2 = vcmask 523264   ;;  %v3049_v32 = vmov 0  }
  0x2d   : > { %s3658_s24 = smov (!%p424_p8, %s2495_s24), 3  ;;  %2647 = vmatpush3.msk.msra.mxu0 %vm453_vm0, %v441_v0  ;;  %574 = vmatpush1.msra.mxu1 %v548_v5  ;;  %v545_v8 = vld [vmem:[%s3627_s3 + $0x58] sm:$0xff]  ;;  %v544_v9 = vld [vmem:[%s3627_s3 + $0x50] sm:$0xff]  ;;  %v543_v10 = vld [vmem:[%s3627_s3 + $0x48] sm:$0xff]  ;;  %v3050_v33 = vmov 4   ;;  %vm673_vm3 = vcmask 130048  }
  0x2e   : > { %s2496_s25 = sshll.u32 %s3658_s24, 3  ;;  %2648 = vmatprep.subr.mxu0 %v440_v1  ;;  %575 = vmatprep.subr.mxu1 %v547_v6  ;;  %v542_v11 = vld [vmem:[%s3627_s3 + $0x40] sm:$0xff]  ;;  %v541_v12 = vld [vmem:[%s3627_s3 + $0x38] sm:$0xff]  ;;  %v540_v13 = vld [vmem:[%s3627_s3 + $0x30] sm:$0xff]  ;;  %v444_v23 = vsub.s32 0, %v3255_v22  ;;  %v3051_v47 = vmov 5  }
  0x2f   : > { %2649 = vmatpush3.msra.mxu0 %v440_v1  ;;  %576 = vmatpush1.msra.mxu1 %v546_v7  ;;  %v539_v14 = vld [vmem:[%s3627_s3 + $0x28] sm:$0xff]  ;;  %v538_v15 = vld [vmem:[%s3627_s3 + $0x20] sm:$0xff]  ;;  %v537_v16 = vld [vmem:[%s3627_s3 + $0x18] sm:$0xff]  ;;  %s2498_s16 = sshll.u32 %s3658_s24, 1  ;;  %vm775_vm6 = vcmask 31744   ;;  %vm1286_vm11 = vcmask 261120  }
  0x30   : > { %s427_s29 = scalar_lea.vmem %s3646_s0, %s2496_s25  ;;  %577 = vmatprep.subr.mxu1 %v545_v8  ;;  %v536_v17 = vld [vmem:[%s3627_s3 + $0x10] sm:$0xff]  ;;  %v535_v18 = vld [vmem:[%s3627_s3 + $0x8] sm:$0xff]  ;;  %v534_v19 = vld [vmem:[%s3627_s3] sm:$0xff]  ;;  %621 = vmatprep.mubr.f32.mxu1 %v3048_v20  ;;  %s433_s30 = scalar_lea.vmem %s3625_s1, %s2498_s16 }
  0x31   : > { %v438_v2 = vld [vmem:[%s427_s29] sm:$0xff]  ;;  %v439_v3 = vld [vmem:[%s427_s29 + $0x8] sm:$0xff]  ;;  %578 = vmatpush1.msra.mxu1 %v544_v9  ;;  %2864 = vset.pattern.permute.xlu1 %v3049_v32  ;;  %s3053_s22 = smov 96   ;;  %s3057_s7 = smov 64  }
  0x32   : > { %2650 = vmatprep.mubr.msk.f32.mxu0 %vm446_vm1, %v438_v2  ;;  %579 = vmatprep.subr.mxu1 %v543_v10  ;;  %v3261_v24 = vld [vmem:[%s3630_s6] sm:$0x7]  ;;  %v3285_v39 = vld [vmem:[%s3632_s8 + $0x8] sm:$0xff]  ;;  %s3059_s15 = smov 32   ;;  %s3519_s16 = sand.u32 1, %s3035_s18  }
  0x33   : > { %2651 = vmatmul.mubr.msk.f32.vlgmr.msra.gmra.mxu0 %vm446_vm1, %v439_v3  ;;  %580 = vmatpush1.msra.mxu1 %v542_v11  ;;  %v445_v26 = vrot.slane %v3261_v24, %v444_v23  ;;  %v3277_v38 = vld [vmem:[#allocation2] sm:$0xff]  ;;  %v3294_v45 = vld [vmem:[#allocation2 + $0x8] sm:$0xff]  ;;  %v3052_v3 = vmov 1   ;;  %s3637_s24 = sshll.u32 %s3145_s21, 8 }
  0x34   : > { %581 = vmatprep.subr.mxu1 %v541_v12  ;;  %2863 = vset.pattern.permute.xlu0 %v3050_v33  ;;  %v3291_v42 = vld [vmem:[%s3632_s8] sm:$0xff]  ;;  %v646_v32 = vld [vmem:[%s3628_s4 + $0x8] sm:$0xff]  ;;  %s3540_s14 = scalar_lea.hbm %s3635_s11, %s3637_s24 }
  0x35   : > { %582 = vmatpush1.msra.mxu1 %v540_v13  ;;  %2657 = vmatprep.mubr.msk.f32.mxu0 %vm673_vm3, %v3277_v38  ;;  %v3299_v46 = vld [vmem:[%s3633_s9] sm:$0xf] }
  0x36   : > { %583 = vmatprep.subr.mxu1 %v539_v14  ;;  %v2561_v48 = vld [vmem:[%s433_s30] sm:$0xf]  }
  0x37   : > { %584 = vmatpush1.msra.mxu1 %v538_v15  ;;  %v2563_v50 = vunpack.c.1.s8 %v2561_v48  ;;  %v2562_v51 = vunpack.c.0.s8 %v2561_v48  ;;  %v645_v33 = vld [vmem:[%s3628_s4] sm:$0xff] }
  0x38   : > { %585 = vmatprep.subr.mxu1 %v537_v16 }
  0x39   : > { %586 = vmatpush1.msra.mxu1 %v536_v17  ;;  %v3312_v52 = vcvt.s32.f32 %v2563_v50  ;;  %v3314_v56 = vcvt.s32.f32 %v2562_v51 }
  0x3a   : > { %587 = vmatprep.subr.mxu1 %v535_v18 }
  0x3b   : > { %588 = vmatpush1.msra.mxu1 %v534_v19  ;;  %vm772_vm5 = vcmp.gt.f32.partialorder %v3312_v52, 0.0  ;;  %vm771_vm8 = vcmp.gt.f32.partialorder %v3314_v56, 0.0 }
  0xf3   : > { %v2652_v25 = vpop.f32.mrf.mxu0 }
  0xf4   : > { %v529_v29 = vadd.f32 %v2652_v25, %v445_v26 }
  0xf5   : > { %v523_v27 = vpop.f32.mrf.mxu0 }
  0xf6   : > { %v524_v28 = vadd.f32 %v523_v27, %v445_v26  ;;  %v533_v31 = vmax.f32 %v529_v29, 0.0 }
  0xf8   : > { %v532_v30 = vmax.f32 %v524_v28, 0.0 }
  0xfa   : > { %2502 = vmatmul.mubr.msk.f32.vlgmr.msra.gmra.mxu1 %vm550_vm2, %v532_v30  ;;  %v648_v30 = vld [vmem:[%s3628_s4 + $0x18] sm:$0xff] }
  0xfb   : > { %627 = vmatprep.mubr.f32.mxu1 %v3048_v20  ;;  %2702 = vmatprep.subr.mxu1 %v648_v30 }
  0xfc   : > { %2703 = vmatpush3.msra.mxu1 %v648_v30 }
  0xfe   : > { %2503 = vmatmul.mubr.msk.f32.gmra.mxu1 %vm550_vm2, %v533_v31  ;;  %v647_v31 = vld [vmem:[%s3628_s4 + $0x10] sm:$0xff] }
  0xff   : > { %2704 = vmatprep.subr.mxu1 %v647_v31 }
 0x100   : > { %2705 = vmatpush3.msra.mxu1 %v647_v31 }
 0x101   : > { %2706 = vmatprep.subr.mxu1 %v646_v32 }
 0x102   : > { %2707 = vmatpush3.msra.mxu1 %v646_v32 }
 0x103   : > { %2708 = vmatprep.subr.mxu1 %v645_v33 }
 0x104   : > { %2709 = vmatpush3.msra.mxu1 %v645_v33 }
 0x105   : > { %2720 = vmatprep.subr.msk.mxu1 %vm453_vm0, %v3299_v46 }
 0x1ba   : > { %v3266_v34 = vpop.f32.mrf.mxu1 }
 0x1bc   : > { %v3268_v35 = vpop.f32.mrf.mxu1 }
 0x1bd   : > { %756 = vperm.xlu1 %2864, %v3268_v35  }
 0x1be   : > { %v3271_v36 = vpop.f32.mrf.mxu1 }
 0x1c0   : > { %v3273_v37 = vpop.f32.mrf.mxu1 }
 0x1c1   : > { %760 = vperm.xlu1 %2864, %v3273_v37   ;;  %668 = vperm.xlu0 %2863, %v3273_v37  }
 0x1c5   : > { %663 = vperm.xlu0 %2863, %v3268_v35   ;;  %2865 = vset.pattern.permute.xlu1 %v3051_v47 }
 0x1c9   : > { %2866 = vset.pattern.permute.xlu0 %v3051_v47 }
 0x238   : > { %v757_v49 = vpop.permute.xlu1 %756 }
 0x23c   : > { %v669_v40 = vpop.permute.xlu0 %668  ;;  %v761_v53 = vpop.permute.xlu1 %760 }
 0x23d   : > { %v672_v41 = vmul.f32 %v669_v40, %v3285_v39 }
 0x23f   : > { %2653 = vmatprep.subr.mxu0 %v672_v41 }
 0x240   : > { %2654 = vmatpush3.msra.mxu0 %v672_v41  ;;  %v664_v43 = vpop.permute.xlu0 %663 }
 0x241   : > { %v671_v44 = vmul.f32 %v664_v43, %v3291_v42 }
 0x243   : > { %2655 = vmatprep.subr.mxu0 %v671_v44 }
 0x244   : > { %2656 = vmatpush3.msra.mxu0 %v671_v44 }
 0x245   : > { %2658 = vmatmul.mubr.msk.f32.vlgmr.msra.gmra.mxu0 %vm673_vm3, %v3294_v45  ;;  %2660 = vmatprep.subr.msk.mxu0 %vm453_vm0, %v3299_v46 }
 0x246   : > { %2661 = vmatpush3.msk.msra.mxu0 %vm453_vm0, %v3299_v46 }
 0x247   : > { %2665 = vmatprep.subr.mxu0 %v3271_v36 }
 0x305   : > { %v2659_v54 = vpop.f32.mrf.mxu0 }
 0x306   : > { %v764_v55 = vadd.f32 %v2659_v54, %v761_v53 }
 0x307   : > { %v746_v57 = vpop.f32.mrf.mxu0 }
 0x308   : > { %v768_v58 = vmul.f32 0.2, %v764_v55  ;;  %v763_v59 = vadd.f32 %v757_v49, %v746_v57  ;;  %vm766_vm4 = vcmp.gt.f32.partialorder %v764_v55, 0.0 }
 0x30a   : > { %v767_v60 = vmul.f32 0.2, %v763_v59  ;;  %v770_v61 = vsel %vm766_vm4, %v764_v55, %v768_v58  ;;  %vm765_vm7 = vcmp.gt.f32.partialorder %v763_v59, 0.0 }
 0x30b   : > { %v774_v62 = vsel %vm772_vm5, %v770_v61, -9e+15 }
 0x30c   : > { %v779_v63 = vsel %vm775_vm6, %v774_v62, -inf  ;;  %v769_v0 = vsel %vm765_vm7, %v763_v59, %v767_v60 }
 0x30d   : > { %780 = vmax.xlane.f32.xlu1 %v779_v63  ;;  %v773_v1 = vsel %vm771_vm8, %v769_v0, -9e+15 }
 0x30e   : > { %v776_v2 = vsel %vm775_vm6, %v773_v1, -inf }
 0x30f   : > { %777 = vmax.xlane.f32.xlu0 %v776_v2 }
 0x31e   : > { %982 = vperm.xlu1 %2865, %v3273_v37  }
 0x322   : > { %2867 = vset.pattern.permute.xlu1 %v3052_v3 }
 0x323   : > { %1063 = vperm.xlu1 %2867, %v3268_v35  }
 0x327   : > { %1067 = vperm.xlu1 %2867, %v3273_v37  }
 0x396   : > { %v781_v4 = vpop.xlane.xlu1 %780 }
 0x397   : > { %v783_v5 = vsub.f32 %v774_v62, %v781_v4 }
 0x398   : > { %v778_v6 = vpop.xlane.xlu0 %777 }
 0x399   : > { %v782_v7 = vsub.f32 %v773_v1, %v778_v6  ;;  %v786_v8 = vmul.f32 1.442695, %v783_v5 }
 0x39a   : > { %v983_v20 = vpop.permute.xlu1 %982 }
 0x39b   : > { %v784_v9 = vmul.f32 1.442695, %v782_v7  ;;  %v986_v21 = vmul.f32 %v983_v20, %v3285_v39  ;;  %v3054_v7 = vmov 6  }
 0x39c   : > { %2868 = vset.pattern.permute.xlu1 %v3054_v7 }
 0x39d   : > { %2874 = vpow2.f32 %v784_v9 }
 0x39e   : > { %2876 = vpow2.f32 %v786_v8  ;;  %v1064_v40 = vpop.permute.xlu1 %1063 }
 0x3a2   : > { %v1068_v49 = vpop.permute.xlu1 %1067 }
 0x3aa   : > { %v2875_v10 = vpop.eup %2874 }
 0x3ab   : > { %v788_v11 = vsel %vm775_vm6, %v2875_v10, 0.0  ;;  %v2877_v12 = vpop.eup %2876 }
 0x3ac   : > { %789 = vadd.xlane.f32.xlu0 %v788_v11  ;;  %v791_v13 = vsel %vm775_vm6, %v2877_v12, 0.0 }
 0x3b0   : > { %792 = vadd.xlane.f32.xlu0 %v791_v13 }
 0x3c6   : > { %978 = vperm.xlu0 %2866, %v3268_v35  }
 0x435   : > { %v790_v14 = vpop.xlane.xlu0 %789 }
 0x436   : > { %2878 = vrcp.f32 %v790_v14 }
 0x439   : > { %v793_v15 = vpop.xlane.xlu0 %792 }
 0x43a   : > { %2880 = vrcp.f32 %v793_v15 }
 0x441   : > { %v979_v26 = vpop.permute.xlu0 %978 }
 0x442   : > { %v985_v29 = vmul.f32 %v979_v26, %v3291_v42 }
 0x443   : > { %v2879_v16 = vpop.eup %2878 }
 0x444   : > { %v796_v17 = vmul.f32 %v2879_v16, %v2875_v10 }
 0x446   : > { %2662 = vmatprep.mubr.msk.f32.mxu0 %vm775_vm6, %v796_v17 }
 0x447   : > { %v2881_v18 = vpop.eup %2880 }
 0x448   : > { %v797_v19 = vmul.f32 %v2881_v18, %v2877_v12  ;;  %v3055_v18 = vmov 2  }
 0x44a   : > { %2663 = vmatmul.mubr.msk.f32.vlgmr.msra.gmra.mxu0 %vm775_vm6, %v797_v19 }
 0x44b   : > { %2666 = vmatpush3.msra.mxu0 %v3271_v36 }
 0x44c   : > { %2667 = vmatprep.subr.mxu0 %v3266_v34 }
 0x44d   : > { %2668 = vmatpush3.msra.mxu0 %v3266_v34 }
 0x44e   : > { %2672 = vmatprep.subr.mxu0 %v986_v21 }
 0x50a   : > { %v2664_v23 = vpop.f32.mrf.mxu0 }
 0x50b   : > { %v883_v28 = vmul.f32 %v2664_v23, %v3294_v45 }
 0x50c   : > { %v873_v25 = vpop.f32.mrf.mxu0 }
 0x50d   : > { %v882_v27 = vmul.f32 %v873_v25, %v3277_v38 }
 0x50f   : > { %2669 = vmatprep.mubr.msk.f32.mxu0 %vm673_vm3, %v882_v27 }
 0x510   : > { %2670 = vmatmul.mubr.msk.f32.vlgmr.msra.gmra.mxu0 %vm673_vm3, %v883_v28 }
 0x511   : > { %2673 = vmatpush3.msra.mxu0 %v986_v21  ;;  %2676 = vmatprep.mubr.msk.f32.mxu0 %vm673_vm3, %v3277_v38 }
 0x512   : > { %2674 = vmatprep.subr.mxu0 %v985_v29 }
 0x513   : > { %2675 = vmatpush3.msra.mxu0 %v985_v29  ;;  %v652_v29 = vld [vmem:[%s3628_s4 + $0x38] sm:$0xff] }
 0x514   : > { %2677 = vmatmul.mubr.msk.f32.vlgmr.msra.gmra.mxu0 %vm673_vm3, %v3294_v45  ;;  %2679 = vmatprep.subr.msk.mxu0 %vm453_vm0, %v3299_v46 }
 0x515   : > { %2680 = vmatpush3.msk.msra.mxu0 %vm453_vm0, %v3299_v46 }
 0x5d0   : > { %v2671_v41 = vpop.f32.mrf.mxu0 }
 0x5d1   : > { %v968_v43 = vmin.f32 %v2671_v41, 0.0  ;;  %vm966_vm13 = vcmp.gt.f32.partialorder %v2671_v41, 0.0 }
 0x5d2   : > { %v956_v44 = vpop.f32.mrf.mxu0 }
 0x5d3   : > { %v971_v47 = vmul.f32 1.442695, %v968_v43  ;;  %v967_v48 = vmin.f32 %v956_v44, 0.0  ;;  %vm965_vm12 = vcmp.gt.f32.partialorder %v956_v44, 0.0 }
 0x5d4   : > { %v2678_v50 = vpop.f32.mrf.mxu0 }
 0x5d5   : > { %2882 = vpow2.f32 %v971_v47  ;;  %v969_v51 = vmul.f32 1.442695, %v967_v48  ;;  %v1071_v53 = vadd.f32 %v2678_v50, %v1068_v49 }
 0x5d6   : > { %v1053_v54 = vpop.f32.mrf.mxu0 }
 0x5d7   : > { %2884 = vpow2.f32 %v969_v51  ;;  %v1075_v55 = vmul.f32 0.2, %v1071_v53  ;;  %v1070_v57 = vadd.f32 %v1064_v40, %v1053_v54  ;;  %vm1073_vm9 = vcmp.gt.f32.partialorder %v1071_v53, 0.0  ;;  %v651_v40 = vld [vmem:[%s3628_s4 + $0x30] sm:$0xff] }
 0x5d9   : > { %v1074_v58 = vmul.f32 0.2, %v1070_v57  ;;  %v1077_v59 = vsel %vm1073_vm9, %v1071_v53, %v1075_v55  ;;  %vm1072_vm10 = vcmp.gt.f32.partialorder %v1070_v57, 0.0 }
 0x5da   : > { %v1079_v60 = vsel %vm772_vm5, %v1077_v59, -9e+15 }
 0x5db   : > { %v1083_v61 = vsel %vm775_vm6, %v1079_v60, -inf  ;;  %v1076_v62 = vsel %vm1072_vm10, %v1070_v57, %v1074_v58 }
 0x5dc   : > { %1084 = vmax.xlane.f32.xlu0 %v1083_v61  ;;  %v1078_v63 = vsel %vm771_vm8, %v1076_v62, -9e+15 }
 0x5dd   : > { %v1080_v0 = vsel %vm775_vm6, %v1078_v63, -inf }
 0x5de   : > { %1081 = vmax.xlane.f32.xlu1 %v1080_v0  ;;  %v3056_v0 = vmov 7  }
 0x5df   : > { %2871 = vset.pattern.permute.xlu0 %v3056_v0 }
 0x5e2   : > { %v2883_v1 = vpop.eup %2882 }
 0x5e3   : > { %v2512_v3 = vadd.f32 -1.0, %v2883_v1 }
 0x5e4   : > { %v2885_v2 = vpop.eup %2884 }
 0x5e5   : > { %v2511_v4 = vadd.f32 -1.0, %v2885_v2  ;;  %v976_v6 = vsel %vm966_vm13, %v2671_v41, %v2512_v3  ;;  %v650_v41 = vld [vmem:[%s3628_s4 + $0x28] sm:$0xff] }
 0x5e7   : > { %v975_v5 = vsel %vm965_vm12, %v956_v44, %v2511_v4  ;;  %v649_v44 = vld [vmem:[%s3628_s4 + $0x20] sm:$0xff] }
 0x5e8   : > { %2710 = vmatprep.mubr.msk.f32.mxu1 %vm1286_vm11, %v975_v5 }
 0x5e9   : > { %2711 = vmatmul.mubr.msk.f32.vlgmr.msra.gmra.mxu1 %vm1286_vm11, %v976_v6 }
 0x5ea   : > { %2721 = vmatpush3.msk.msra.mxu1 %vm453_vm0, %v3299_v46 }
 0x5f2   : > { %1187 = vrot.lane.b32.xlu0 %v3266_v34, %s3053_s22 }
 0x665   : > { %v1085_v8 = vpop.xlane.xlu0 %1084 }
 0x666   : > { %v1087_v9 = vsub.f32 %v1079_v60, %v1085_v8 }
 0x667   : > { %v1082_v10 = vpop.xlane.xlu1 %1081 }
 0x668   : > { %v1086_v11 = vsub.f32 %v1078_v63, %v1082_v10  ;;  %v1090_v12 = vmul.f32 1.442695, %v1087_v9 }
 0x669   : > { %v1188_v28 = vpop.permute.xlu0 %1187 }
 0x66a   : > { %v1088_v13 = vmul.f32 1.442695, %v1086_v11 }
 0x66c   : > { %2886 = vpow2.f32 %v1088_v13 }
 0x66d   : > { %2888 = vpow2.f32 %v1090_v12 }
 0x679   : > { %v2887_v14 = vpop.eup %2886 }
 0x67a   : > { %v1092_v15 = vsel %vm775_vm6, %v2887_v14, 0.0  ;;  %v2889_v16 = vpop.eup %2888 }
 0x67b   : > { %1093 = vadd.xlane.f32.xlu1 %v1092_v15  ;;  %v1095_v17 = vsel %vm775_vm6, %v2889_v16, 0.0 }
 0x67f   : > { %1096 = vadd.xlane.f32.xlu1 %v1095_v17  ;;  %v3058_v17 = vmov 3  }
 0x690   : > { %1189 = vrot.lane.b32.xlu1 %v3271_v36, %s3053_s22  ;;  %s3636_s22 = sshll.u32 %s3519_s16, 4 }
 0x691   : > { %s422_s25 = scalar_lea.vmem [#allocation6], %s3636_s22 }
 0x692   : > { %s2369_s30 = sshll.u32 %s422_s25, 4  ;;  %s3532_s30 = int_to_ptr.vmem [resolvable:$true] %s2369_s30 }
 0x693   : > { %s2949_s29 = scalar_lea.vmem %s3532_s30, 256 }
 0x694   : > { %1454 = vperm.xlu1 %2868, %v3273_v37   ;;  %p2950_p6 = scmp.ne.s32.totalorder %s3532_s30, %s2949_s29 }
 0x696   : > { %p2951_p9 = pnand %p2950_p6, %p3162_p5 }
 0x698   : > { %1450 = vperm.xlu1 %2868, %v3268_v35   ;;  %p2952_p10 = pneg %p2951_p9 }
 0x69c   : > { %2869 = vset.pattern.permute.xlu1 %v3055_v18 }
 0x69d   : > { %1535 = vperm.xlu1 %2869, %v3268_v35  }
 0x6a1   : > { %1539 = vperm.xlu1 %2869, %v3273_v37  }
 0x6a5   : > { %2870 = vset.pattern.permute.xlu1 %v3056_v0 }
 0x704   : > { %v1094_v19 = vpop.xlane.xlu1 %1093 }
 0x705   : > { %2890 = vrcp.f32 %v1094_v19 }
 0x708   : > { %v1097_v20 = vpop.xlane.xlu1 %1096 }
 0x709   : > { %2892 = vrcp.f32 %v1097_v20 }
 0x70c   : > { %v1190_v21 = vpop.permute.xlu1 %1189 }
 0x70d   : > { %2684 = vmatprep.subr.mxu0 %v1190_v21 }
 0x710   : > { %v1455_v43 = vpop.permute.xlu1 %1454 }
 0x711   : > { %v1458_v47 = vmul.f32 %v1455_v43, %v3285_v39 }
 0x712   : > { %v2891_v23 = vpop.eup %2890 }
 0x713   : > { %v1100_v25 = vmul.f32 %v2891_v23, %v2887_v14 }
 0x714   : > { %v1451_v60 = vpop.permute.xlu1 %1450 }
 0x715   : > { %2681 = vmatprep.mubr.msk.f32.mxu0 %vm775_vm6, %v1100_v25  ;;  %v1457_v63 = vmul.f32 %v1451_v60, %v3291_v42 }
 0x716   : > { %v2893_v26 = vpop.eup %2892 }
 0x717   : > { %v1101_v27 = vmul.f32 %v2893_v26, %v2889_v16 }
 0x718   : > { %v1536_v1 = vpop.permute.xlu1 %1535 }
 0x719   : > { %2682 = vmatmul.mubr.msk.f32.vlgmr.msra.gmra.mxu0 %vm775_vm6, %v1101_v27 }
 0x71a   : > { %2685 = vmatpush3.msra.mxu0 %v1190_v21 }
 0x71b   : > { %2686 = vmatprep.subr.mxu0 %v1188_v28 }
 0x71c   : > { %2687 = vmatpush3.msra.mxu0 %v1188_v28  ;;  %v1540_v4 = vpop.permute.xlu1 %1539 }
 0x71d   : > { %2691 = vmatprep.subr.mxu0 %v652_v29 }
 0x7d9   : > { %v2683_v30 = vpop.f32.mrf.mxu0 }
 0x7da   : > { %v1184_v33 = vmul.f32 %v2683_v30, %v3294_v45 }
 0x7db   : > { %v1174_v31 = vpop.f32.mrf.mxu0 }
 0x7dc   : > { %v1183_v32 = vmul.f32 %v1174_v31, %v3277_v38 }
 0x7de   : > { %2688 = vmatprep.mubr.msk.f32.mxu0 %vm673_vm3, %v1183_v32 }
 0x7df   : > { %2689 = vmatmul.mubr.msk.f32.vlgmr.msra.gmra.mxu0 %vm673_vm3, %v1184_v33 }
 0x7e0   : > { %2692 = vmatpush3.msra.mxu0 %v652_v29 }
 0x7e1   : > { %2693 = vmatprep.subr.mxu0 %v651_v40 }
 0x7e2   : > { %2694 = vmatpush3.msra.mxu0 %v651_v40 }
 0x7e3   : > { %2695 = vmatprep.subr.mxu0 %v650_v41 }
 0x7e4   : > { %2696 = vmatpush3.msra.mxu0 %v650_v41 }
 0x7e5   : > { %2697 = vmatprep.subr.mxu0 %v649_v44 }
 0x7e6   : > { %2698 = vmatpush3.msra.mxu0 %v649_v44 }
 0x7e7   : > { %2713 = vmatprep.subr.mxu0 %v1458_v47 }
 0x89f   : > { %v2690_v48 = vpop.f32.mrf.mxu0 }
 0x8a0   : > { %v1277_v49 = vmin.f32 %v2690_v48, 0.0  ;;  %vm1275_vm15 = vcmp.gt.f32.partialorder %v2690_v48, 0.0 }
 0x8a1   : > { %v1265_v50 = vpop.f32.mrf.mxu0 }
 0x8a2   : > { %v1280_v51 = vmul.f32 1.442695, %v1277_v49  ;;  %v1276_v53 = vmin.f32 %v1265_v50, 0.0  ;;  %vm1274_vm14 = vcmp.gt.f32.partialorder %v1265_v50, 0.0 }
 0x8a4   : > { %2894 = vpow2.f32 %v1280_v51  ;;  %v1278_v54 = vmul.f32 1.442695, %v1276_v53 }
 0x8a6   : > { %2896 = vpow2.f32 %v1278_v54 }
 0x8b1   : > { %v2895_v55 = vpop.eup %2894 }
 0x8b2   : > { %v2521_v58 = vadd.f32 -1.0, %v2895_v55  ;;  %v655_v55 = vld [vmem:[%s3628_s4 + $0x50] sm:$0xff] }
 0x8b3   : > { %v2897_v57 = vpop.eup %2896 }
 0x8b4   : > { %v2520_v59 = vadd.f32 -1.0, %v2897_v57  ;;  %v1285_v62 = vsel %vm1275_vm15, %v2690_v48, %v2521_v58  ;;  %v654_v57 = vld [vmem:[%s3628_s4 + $0x48] sm:$0xff] }
 0x8b6   : > { %v1284_v61 = vsel %vm1274_vm14, %v1265_v50, %v2520_v59 }
 0x8b7   : > { %2699 = vmatprep.mubr.msk.f32.mxu0 %vm1286_vm11, %v1284_v61 }
 0x8b8   : > { %2700 = vmatmul.mubr.msk.f32.vlgmr.msra.gmra.mxu0 %vm1286_vm11, %v1285_v62 }
 0x8b9   : > { %2714 = vmatpush3.msra.mxu0 %v1458_v47  ;;  %2717 = vmatprep.mubr.msk.f32.mxu0 %vm673_vm3, %v3277_v38  ;;  %v3428_v47 = vpop.f32.mrf.mxu1 }
 0x8ba   : > { %2715 = vmatprep.subr.mxu0 %v1457_v63 }
 0x8bb   : > { %2716 = vmatpush3.msra.mxu0 %v1457_v63  ;;  %v3430_v48 = vpop.f32.mrf.mxu1 }
 0x8bc   : > { %2718 = vmatmul.mubr.msk.f32.vlgmr.msra.gmra.mxu0 %vm673_vm3, %v3294_v45 }
 0x978   : > { %v3407_v2 = vpop.f32.mrf.mxu0 }
 0x97a   : > { %v3409_v3 = vpop.f32.mrf.mxu0 }
 0x97c   : > { %v2719_v5 = vpop.f32.mrf.mxu0 }
 0x97d   : > { %v1543_v6 = vadd.f32 %v2719_v5, %v1540_v4 }
 0x97e   : > { %v1525_v7 = vpop.f32.mrf.mxu0 }
 0x97f   : > { %v1547_v8 = vmul.f32 0.2, %v1543_v6  ;;  %v1542_v9 = vadd.f32 %v1536_v1, %v1525_v7  ;;  %vm1545_vm1 = vcmp.gt.f32.partialorder %v1543_v6, 0.0 }
 0x981   : > { %v1546_v10 = vmul.f32 0.2, %v1542_v9  ;;  %v1549_v11 = vsel %vm1545_vm1, %v1543_v6, %v1547_v8  ;;  %vm1544_vm4 = vcmp.gt.f32.partialorder %v1542_v9, 0.0 }
 0x982   : > { %v1551_v12 = vsel %vm772_vm5, %v1549_v11, -9e+15 }
 0x983   : > { %v1555_v13 = vsel %vm775_vm6, %v1551_v12, -inf  ;;  %v1548_v14 = vsel %vm1544_vm4, %v1542_v9, %v1546_v10 }
 0x984   : > { %1556 = vmax.xlane.f32.xlu1 %v1555_v13  ;;  %v1550_v15 = vsel %vm771_vm8, %v1548_v14, -9e+15 }
 0x985   : > { %v1552_v16 = vsel %vm775_vm6, %v1550_v15, -inf }
 0x986   : > { %1553 = vmax.xlane.f32.xlu0 %v1552_v16 }
 0x995   : > { %1844 = vperm.xlu1 %2870, %v3273_v37  }
 0x999   : > { %1659 = vrot.lane.b32.xlu1 %v3271_v36, %s3057_s7 }
 0x99a   : > { %2872 = vset.pattern.permute.xlu1 %v3058_v17 }
 0x99d   : > { %1657 = vrot.lane.b32.xlu1 %v3266_v34, %s3057_s7  ;;  %s3060_s7 = smov [#allocation6]  }
 0x9a1   : > { %1925 = vperm.xlu1 %2872, %v3268_v35  }
 0x9a5   : > { %1929 = vperm.xlu1 %2872, %v3273_v37  }
 0xa0d   : > { %v1557_v18 = vpop.xlane.xlu1 %1556 }
 0xa0e   : > { %v1559_v19 = vsub.f32 %v1551_v12, %v1557_v18 }
 0xa0f   : > { %v1554_v20 = vpop.xlane.xlu0 %1553 }
 0xa10   : > { %v1558_v21 = vsub.f32 %v1550_v15, %v1554_v20  ;;  %v1562_v25 = vmul.f32 1.442695, %v1559_v19 }
 0xa11   : > { %v1845_v23 = vpop.permute.xlu1 %1844 }
 0xa12   : > { %v1560_v26 = vmul.f32 1.442695, %v1558_v21  ;;  %v1848_v29 = vmul.f32 %v1845_v23, %v3285_v39 }
 0xa14   : > { %2898 = vpow2.f32 %v1560_v26 }
 0xa15   : > { %v1660_v27 = vpop.permute.xlu1 %1659  ;;  %2900 = vpow2.f32 %v1562_v25 }
 0xa16   : > { %2725 = vmatprep.subr.mxu0 %v1660_v27 }
 0xa17   : > { %2726 = vmatpush3.msra.mxu0 %v1660_v27 }
 0xa19   : > { %v1658_v28 = vpop.permute.xlu1 %1657 }
 0xa1a   : > { %2727 = vmatprep.subr.mxu0 %v1658_v28 }
 0xa1b   : > { %2728 = vmatpush3.msra.mxu0 %v1658_v28 }
 0xa1c   : > { %2743 = vmatprep.subr.mxu0 %v1848_v29 }
 0xa1d   : > { %v1926_v58 = vpop.permute.xlu1 %1925 }
 0xa21   : > { %v2899_v30 = vpop.eup %2898  ;;  %v1930_v0 = vpop.permute.xlu1 %1929 }
 0xa22   : > { %v1564_v37 = vsel %vm775_vm6, %v2899_v30, 0.0  ;;  %v2901_v31 = vpop.eup %2900 }
 0xa23   : > { %1565 = vadd.xlane.f32.xlu0 %v1564_v37  ;;  %v1567_v32 = vsel %vm775_vm6, %v2901_v31, 0.0 }
 0xa27   : > { %1568 = vadd.xlane.f32.xlu0 %v1567_v32 }
 0xa3d   : > { %1840 = vperm.xlu0 %2871, %v3268_v35  }
 0xa41   : > { %2873 = vset.pattern.permute.xlu0 %v3058_v17 }
 0xaac   : > { %v1566_v33 = vpop.xlane.xlu0 %1565 }
 0xaad   : > { %2902 = vrcp.f32 %v1566_v33 }
 0xab0   : > { %v1569_v40 = vpop.xlane.xlu0 %1568 }
 0xab1   : > { %2904 = vrcp.f32 %v1569_v40 }
 0xab8   : > { %v1841_v35 = vpop.permute.xlu0 %1840 }
 0xab9   : > { %v1847_v54 = vmul.f32 %v1841_v35, %v3291_v42  ;;  %v656_v42 = vld [vmem:[%s3628_s4 + $0x58] sm:$0xff] }
 0xaba   : > { %v2903_v41 = vpop.eup %2902  ;;  %2732 = vmatprep.subr.mxu1 %v656_v42 }
 0xabb   : > { %v1572_v39 = vmul.f32 %v2903_v41, %v2899_v30 }
 0xabd   : > { %2722 = vmatprep.mubr.msk.f32.mxu1 %vm775_vm6, %v1572_v39 }
 0xabe   : > { %v2905_v43 = vpop.eup %2904 }
 0xabf   : > { %v1573_v44 = vmul.f32 %v2905_v43, %v2901_v31 }
 0xac1   : > { %2723 = vmatmul.mubr.msk.f32.vlgmr.msra.gmra.mxu1 %vm775_vm6, %v1573_v44 }
 0xac2   : > { %2733 = vmatpush3.msra.mxu1 %v656_v42  ;;  %v2245_v42 = vld [vmem:[%s3629_s5 + $0x30] sm:$0xff] }
 0xac3   : > { %2734 = vmatprep.subr.mxu1 %v655_v55 }
 0xac4   : > { %2735 = vmatpush3.msra.mxu1 %v655_v55  ;;  %v2244_v55 = vld [vmem:[%s3629_s5 + $0x28] sm:$0xff] }
 0xac5   : > { %2736 = vmatprep.subr.mxu1 %v654_v57 }
 0xac6   : > { %2737 = vmatpush3.msra.mxu1 %v654_v57 }
 0xb81   : > { %v2724_v49 = vpop.f32.mrf.mxu1 }
 0xb82   : > { %v1656_v53 = vmul.f32 %v2724_v49, %v3294_v45 }
 0xb83   : > { %v1646_v50 = vpop.f32.mrf.mxu1 }
 0xb84   : > { %v1655_v51 = vmul.f32 %v1646_v50, %v3277_v38 }
 0xb86   : > { %2729 = vmatprep.mubr.msk.f32.mxu0 %vm673_vm3, %v1655_v51  ;;  %v660_v51 = vld [vmem:[%s3628_s4 + $0x78] sm:$0xff] }
 0xb87   : > { %2730 = vmatmul.mubr.msk.f32.vlgmr.msra.gmra.mxu0 %vm673_vm3, %v1656_v53  ;;  %v659_v53 = vld [vmem:[%s3628_s4 + $0x70] sm:$0xff] }
 0xb88   : > { %2744 = vmatpush3.msra.mxu0 %v1848_v29  ;;  %2747 = vmatprep.mubr.msk.f32.mxu0 %vm673_vm3, %v3277_v38 }
 0xb89   : > { %2745 = vmatprep.subr.mxu0 %v1847_v54 }
 0xb8a   : > { %2746 = vmatpush3.msra.mxu0 %v1847_v54  ;;  %v2246_v54 = vld [vmem:[%s3629_s5 + $0x38] sm:$0xff] }
 0xb8b   : > { %2748 = vmatmul.mubr.msk.f32.vlgmr.msra.gmra.mxu0 %vm673_vm3, %v3294_v45  ;;  %2750 = vmatprep.subr.msk.mxu0 %vm453_vm0, %v3299_v46 }
 0xb8c   : > { %2751 = vmatpush3.msk.msra.mxu0 %vm453_vm0, %v3299_v46  ;;  %v653_v46 = vld [vmem:[%s3628_s4 + $0x40] sm:$0xff] }
 0xb8d   : > { %2738 = vmatprep.subr.mxu1 %v653_v46  ;;  %2762 = vmatprep.subr.mxu0 %v660_v51 }
 0xb8e   : > { %2739 = vmatpush3.msra.mxu1 %v653_v46 }
 0xc47   : > { %v2731_v59 = vpop.f32.mrf.mxu0 }
 0xc48   : > { %v1747_v60 = vmin.f32 %v2731_v59, 0.0  ;;  %vm1745_vm10 = vcmp.gt.f32.partialorder %v2731_v59, 0.0 }
 0xc49   : > { %v1735_v61 = vpop.f32.mrf.mxu0 }
 0xc4a   : > { %v1750_v62 = vmul.f32 1.442695, %v1747_v60  ;;  %v1746_v63 = vmin.f32 %v1735_v61, 0.0  ;;  %vm1744_vm9 = vcmp.gt.f32.partialorder %v1735_v61, 0.0 }
 0xc4b   : > { %v2749_v1 = vpop.f32.mrf.mxu0 }
 0xc4c   : > { %2906 = vpow2.f32 %v1750_v62  ;;  %v1748_v4 = vmul.f32 1.442695, %v1746_v63  ;;  %v1933_v5 = vadd.f32 %v2749_v1, %v1930_v0 }
 0xc4d   : > { %v1915_v6 = vpop.f32.mrf.mxu0 }
 0xc4e   : > { %2908 = vpow2.f32 %v1748_v4  ;;  %v1937_v7 = vmul.f32 0.2, %v1933_v5  ;;  %v1932_v8 = vadd.f32 %v1926_v58, %v1915_v6  ;;  %vm1935_vm0 = vcmp.gt.f32.partialorder %v1933_v5, 0.0 }
 0xc50   : > { %v1936_v9 = vmul.f32 0.2, %v1932_v8  ;;  %v1939_v10 = vsel %vm1935_vm0, %v1933_v5, %v1937_v7  ;;  %vm1934_vm7 = vcmp.gt.f32.partialorder %v1932_v8, 0.0  ;;  %v2243_v7 = vld [vmem:[%s3629_s5 + $0x20] sm:$0xff] }
 0xc51   : > { %v1941_v11 = vsel %vm772_vm5, %v1939_v10, -9e+15  ;;  %v2240_v10 = vld [vmem:[%s3629_s5 + $0x8] sm:$0xff] }
 0xc52   : > { %v1945_v12 = vsel %vm775_vm6, %v1941_v11, -inf  ;;  %v1938_v13 = vsel %vm1934_vm7, %v1932_v8, %v1936_v9  ;;  %v2242_v8 = vld [vmem:[%s3629_s5 + $0x18] sm:$0xff]  ;;  %v2241_v9 = vld [vmem:[%s3629_s5 + $0x10] sm:$0xff] }
 0xc53   : > { %1946 = vmax.xlane.f32.xlu0 %v1945_v12  ;;  %v1940_v14 = vsel %vm771_vm8, %v1938_v13, -9e+15  ;;  %v2231_v12 = vsub.s32 1, %v3255_v22  ;;  %v1441_v13 = vadd.f32 %v3430_v48, %v3409_v3 }
 0xc54   : > { %v1942_v15 = vsel %vm775_vm6, %v1940_v14, -inf }
 0xc55   : > { %1943 = vmax.xlane.f32.xlu1 %v1942_v15 }
 0xc59   : > { %v2907_v16 = vpop.eup %2906 }
 0xc5a   : > { %v2534_v18 = vadd.f32 -1.0, %v2907_v16 }
 0xc5b   : > { %v2909_v17 = vpop.eup %2908 }
 0xc5c   : > { %v2533_v19 = vadd.f32 -1.0, %v2909_v17  ;;  %v1755_v21 = vsel %vm1745_vm10, %v2731_v59, %v2534_v18 }
 0xc5e   : > { %v1754_v20 = vsel %vm1744_vm9, %v1735_v61, %v2533_v19 }
 0xc5f   : > { %2740 = vmatprep.mubr.msk.f32.mxu1 %vm1286_vm11, %v1754_v20 }
 0xc60   : > { %2741 = vmatmul.mubr.msk.f32.vlgmr.msra.gmra.mxu1 %vm1286_vm11, %v1755_v21 }
 0xc69   : > { %2049 = vrot.lane.b32.xlu0 %v3271_v36, %s3059_s15  ;;  %v1446_v36 = vadd.f32 %v3428_v47, %v3407_v2 }
 0xcdc   : > { %v1947_v52 = vpop.xlane.xlu0 %1946 }
 0xcdd   : > { %v1949_v56 = vsub.f32 %v1941_v11, %v1947_v52  ;;  %v2239_v11 = vld [vmem:[%s3629_s5] sm:$0xff] }
 0xcde   : > { %v1944_v23 = vpop.xlane.xlu1 %1943 }
 0xcdf   : > { %v1948_v25 = vsub.f32 %v1940_v14, %v1944_v23  ;;  %v1952_v27 = vmul.f32 1.442695, %v1949_v56  ;;  %v2232_v14 = vrot.slane %v3261_v24, %v2231_v12 }
 0xce0   : > { %v2050_v26 = vpop.permute.xlu0 %2049 }
 0xce1   : > { %v1950_v28 = vmul.f32 1.442695, %v1948_v25  ;;  %2755 = vmatprep.subr.mxu1 %v2050_v26 }
 0xce2   : > { %2756 = vmatpush3.msra.mxu1 %v2050_v26 }
 0xce3   : > { %2910 = vpow2.f32 %v1950_v28 }
 0xce4   : > { %2912 = vpow2.f32 %v1952_v27 }
 0xcf0   : > { %v2911_v29 = vpop.eup %2910 }
 0xcf1   : > { %v1954_v30 = vsel %vm775_vm6, %v2911_v29, 0.0  ;;  %v2913_v37 = vpop.eup %2912 }
 0xcf2   : > { %1955 = vadd.xlane.f32.xlu1 %v1954_v30  ;;  %v1957_v31 = vsel %vm775_vm6, %v2913_v37, 0.0 }
 0xcf6   : > { %1958 = vadd.xlane.f32.xlu1 %v1957_v31 }
 0xd07   : > { %2047 = vrot.lane.b32.xlu1 %v3266_v34, %s3059_s15 }
 0xd20   : > { %v2742_v32 = vpop.f32.mrf.mxu1 }
 0xd21   : > { %v3471_v33 = vadd.f32 %v2742_v32, %v1446_v36 }
 0xd22   : > { %v1828_v57 = vpop.f32.mrf.mxu1 }
 0xd23   : > { %v1837_v16 = vadd.f32 %v1828_v57, %v1441_v13 }
 0xd7b   : > { %v1956_v40 = vpop.xlane.xlu1 %1955 }
 0xd7c   : > { %2914 = vrcp.f32 %v1956_v40 }
 0xd7f   : > { %v1959_v41 = vpop.xlane.xlu1 %1958 }
 0xd80   : > { %2916 = vrcp.f32 %v1959_v41 }
 0xd83   : > { %v2048_v39 = vpop.permute.xlu1 %2047 }
 0xd84   : > { %2757 = vmatprep.subr.mxu1 %v2048_v39 }
 0xd85   : > { %2758 = vmatpush3.msra.mxu1 %v2048_v39 }
 0xd86   : > { %2773 = vmatprep.subr.mxu1 %v2246_v54 }
 0xd89   : > { %v2915_v43 = vpop.eup %2914 }
 0xd8a   : > { %v1962_v44 = vmul.f32 %v2915_v43, %v2911_v29 }
 0xd8c   : > { %2752 = vmatprep.mubr.msk.f32.mxu0 %vm775_vm6, %v1962_v44 }
 0xd8d   : > { %v2917_v49 = vpop.eup %2916 }
 0xd8e   : > { %v1963_v50 = vmul.f32 %v2917_v49, %v2913_v37 }
 0xd90   : > { %2753 = vmatmul.mubr.msk.f32.vlgmr.msra.gmra.mxu0 %vm775_vm6, %v1963_v50 }
 0xd91   : > { %2763 = vmatpush3.msra.mxu0 %v660_v51 }
 0xd92   : > { %2764 = vmatprep.subr.mxu0 %v659_v53 }
 0xd93   : > { %2765 = vmatpush3.msra.mxu0 %v659_v53 }
 0xe50   : > { %v2754_v34 = vpop.f32.mrf.mxu0 }
 0xe51   : > { %v2046_v35 = vmul.f32 %v2754_v34, %v3294_v45  ;;  %v657_v45 = vld [vmem:[%s3628_s4 + $0x60] sm:$0xff] }
 0xe52   : > { %v2036_v2 = vpop.f32.mrf.mxu0 }
 0xe53   : > { %v2045_v47 = vmul.f32 %v2036_v2, %v3277_v38  ;;  %v658_v38 = vld [vmem:[%s3628_s4 + $0x68] sm:$0xff] }
 0xe54   : > { %2766 = vmatprep.subr.mxu0 %v658_v38 }
 0xe55   : > { %2759 = vmatprep.mubr.msk.f32.mxu1 %vm673_vm3, %v2045_v47  ;;  %2767 = vmatpush3.msra.mxu0 %v658_v38 }
 0xe56   : > { %2760 = vmatmul.mubr.msk.f32.vlgmr.msra.gmra.mxu1 %vm673_vm3, %v2046_v35  ;;  %2768 = vmatprep.subr.mxu0 %v657_v45 }
 0xe57   : > { %2769 = vmatpush3.msra.mxu0 %v657_v45  ;;  %2774 = vmatpush3.msra.mxu1 %v2246_v54 }
 0xe58   : > { %2775 = vmatprep.subr.mxu1 %v2245_v42 }
 0xe59   : > { %2776 = vmatpush3.msra.mxu1 %v2245_v42 }
 0xe5a   : > { %2777 = vmatprep.subr.mxu1 %v2244_v55 }
 0xe5b   : > { %2778 = vmatpush3.msra.mxu1 %v2244_v55 }
 0xe5c   : > { %2779 = vmatprep.subr.mxu1 %v2243_v7 }
 0xe5d   : > { %2780 = vmatpush3.msra.mxu1 %v2243_v7 }
 0xe5e   : > { %2781 = vmatprep.subr.mxu1 %v2242_v8 }
 0xe5f   : > { %2782 = vmatpush3.msra.mxu1 %v2242_v8 }
 0xe60   : > { %2783 = vmatprep.subr.mxu1 %v2241_v9 }
 0xe61   : > { %2784 = vmatpush3.msra.mxu1 %v2241_v9 }
 0xe62   : > { %2785 = vmatprep.subr.mxu1 %v2240_v10 }
 0xe63   : > { %2786 = vmatpush3.msra.mxu1 %v2240_v10 }
 0xe64   : > { %2787 = vmatprep.subr.mxu1 %v2239_v11 }
 0xe65   : > { %2788 = vmatpush3.msra.mxu1 %v2239_v11 }
 0xf16   : > { %v2761_v46 = vpop.f32.mrf.mxu1 }
 0xf17   : > { %v2137_v58 = vmin.f32 %v2761_v46, 0.0  ;;  %vm2135_vm5 = vcmp.gt.f32.partialorder %v2761_v46, 0.0 }
 0xf18   : > { %v2125_v59 = vpop.f32.mrf.mxu1 }
 0xf19   : > { %v2140_v60 = vmul.f32 1.442695, %v2137_v58  ;;  %v2136_v61 = vmin.f32 %v2125_v59, 0.0  ;;  %vm2134_vm3 = vcmp.gt.f32.partialorder %v2125_v59, 0.0 }
 0xf1b   : > { %2918 = vpow2.f32 %v2140_v60  ;;  %v2138_v62 = vmul.f32 1.442695, %v2136_v61 }
 0xf1d   : > { %2920 = vpow2.f32 %v2138_v62 }
 0xf28   : > { %v2919_v63 = vpop.eup %2918 }
 0xf29   : > { %v2545_v1 = vadd.f32 -1.0, %v2919_v63 }
 0xf2a   : > { %v2921_v0 = vpop.eup %2920 }
 0xf2b   : > { %v2544_v4 = vadd.f32 -1.0, %v2921_v0  ;;  %v2145_v6 = vsel %vm2135_vm5, %v2761_v46, %v2545_v1 }
 0xf2d   : > { %v2144_v5 = vsel %vm2134_vm3, %v2125_v59, %v2544_v4 }
 0xf2e   : > { %2770 = vmatprep.mubr.msk.f32.mxu0 %vm1286_vm11, %v2144_v5 }
 0xf2f   : > { %2771 = vmatmul.mubr.msk.f32.vlgmr.msra.gmra.mxu0 %vm1286_vm11, %v2145_v6 }
 0xfef   : > { %v2772_v15 = vpop.f32.mrf.mxu0 }
 0xff0   : > { %v2228_v17 = vadd.f32 %v2772_v15, %v3471_v33 }
 0xff1   : > { %v2218_v18 = vpop.f32.mrf.mxu0 }
 0xff2   : > { %v2234_v19 = vadd.f32 %v2232_v14, %v2228_v17  ;;  %v2227_v20 = vadd.f32 %v2218_v18, %v1837_v16 }
 0xff4   : > { %v2236_v21 = vmax.f32 %v2234_v19, 0.0  ;;  %v2233_v52 = vadd.f32 %v2232_v14, %v2227_v20 }
 0xff6   : > { %v2235_v56 = vmax.f32 %v2233_v52, 0.0  ;;  %2238 = vst.msk [vmem:[%s422_s25 + $0x8] sm:$0xff] %vm550_vm2, %v2236_v21 }
 0xff8   : > { %2789 = vmatprep.mubr.msk.f32.mxu1 %vm550_vm2, %v2235_v56  ;;  %2237 = vst.msk [vmem:[%s422_s25] sm:$0xff] %vm550_vm2, %v2235_v56  ;;  %s2953_s25 = sshll.u32 %s3060_s7, 4  ;;  %s2954_s25 = int_to_ptr.vmem [resolvable:$false] %s2953_s25 }
 0xff9   : > { %2790 = vmatmul.mubr.msk.f32.vlgmr.msra.gmra.mxu1 %vm550_vm2, %v2236_v21  ;;  %s2955_s22 = scalar_lea.vmem %s2954_s25, 512  ;;  %p2956_p11 = scmp.lt.s32.totalorder %s3532_s30, %s2954_s25 }
 0xffa   : > { %p2957_p12 = scmp.lt.s32.totalorder %s2955_s22, %s2949_s29 }
 0xffc   : > { %p2958_p13 = por %p2957_p12, %p2956_p11 }
 0xffe   : > { %p2959_p0 = pnand %p2958_p13, %p2952_p10 }
0x1000   : > { %2962 = shalt.err (!%p2959_p0)
}
0x1001   : > { %s2963_s12 = scalar_lea.hbm %s3540_s14, 256  ;;  %s2967_s7 = scalar_lea.hbm %s3635_s11, 512 }
0x1002   : > { %p2964_p1 = scmp.ne.s32.totalorder %s3540_s14, %s2963_s12  ;;  %p2968_p4 = scmp.lt.s32.totalorder %s3540_s14, %s3635_s11 }
0x1003   : > { %p2969_p7 = scmp.lt.s32.totalorder %s2967_s7, %s2963_s12 }
0x1004   : > { %p2965_p2 = pnand %p2964_p1, %p3162_p5 }
0x1005   : > { %p2970_p8 = por %p2969_p7, %p2968_p4 }
0x1006   : > { %p2966_p3 = pneg %p2965_p2 }
0x1008   : > { %p2971_p6 = pnand %p2970_p8, %p2966_p3 }
0x100a   : > { %2974 = shalt.err (!%p2971_p6)
}
0x100b   : > { %s3638_s22 = smov 128   ;;  %s3639_s29 = smov 8   ;;  %v2249_v24 = vsub.s32 2, %v3255_v22  ;;  %v2922_v3 = vld [vmem:[%s3630_s6] sm:$0x7] }
0x100c   : > { %s3647_s24 = scalar_lea.sflag [#allocation7], %s3519_s16  ;;  %s3648_s25 = sshll.u32 %s3519_s16, 4 }
0x100d   : > { %2797 = dma.vmem_to_hbm [thread:$0]  (%p3162_p5), %s3532_s30, 256, %s3540_s14, %s3647_s24, %s3638_s22, %s3638_s22, %s3639_s29   ;;  %v2250_v48 = vrot.slane %v2922_v3, %v2249_v24 }
0x100e   : > { %s415_s12 = scalar_lea.vmem [#allocation5], %s3648_s25  ;;  %s3649_s30 = sshll.u32 %s3145_s21, 8 }
0x100f   : > { %s2353_s13 = sshll.u32 %s415_s12, 4  ;;  %s3581_s24 = scalar_lea.hbm %s3634_s10, %s3649_s30  ;;  %s3574_s13 = int_to_ptr.vmem [resolvable:$true] %s2353_s13 }
0x1010   : > { %s2335_s0 = scalar_lea.sflag [#allocation4], %s3519_s16  ;;  %s2975_s15 = scalar_lea.vmem %s3574_s13, 256 }
0x1011   : > { %p2976_p9 = scmp.ne.s32.totalorder %s3574_s13, %s2975_s15  ;;  %s3063_s25 = smov [#allocation5]  }
0x1012   : > { %s2979_s22 = sshll.u32 %s3063_s25, 4  ;;  %s2980_s22 = int_to_ptr.vmem [resolvable:$false] %s2979_s22 }
0x1013   : > { %p2977_p10 = pnand %p2976_p9, %p3162_p5  ;;  %s2981_s29 = scalar_lea.vmem %s2980_s22, 512 }
0x1014   : > { %p2982_p12 = scmp.lt.s32.totalorder %s3574_s13, %s2980_s22  ;;  %p2983_p13 = scmp.lt.s32.totalorder %s2981_s29, %s2975_s15 }
0x1015   : > { %p2978_p11 = pneg %p2977_p10 }
0x1016   : > { %p2984_p0 = por %p2983_p13, %p2982_p12 }
0x1018   : > { %p2985_p1 = pnand %p2984_p0, %p2978_p11 }
0x10b9   : > { %v2791_v23 = vpop.f32.mrf.mxu1 }
0x10ba   : > { %v2329_v25 = vadd.f32 %v2791_v23, %v2250_v48 }
0x10bb   : > { %v2323_v26 = vpop.f32.mrf.mxu1 }
0x10bc   : > { %2333 = vst [vmem:[%s415_s12 + $0x8] sm:$0xff] %v2329_v25  ;;  %v2324_v27 = vadd.f32 %v2323_v26, %v2250_v48 }
0x10be   : > { %2332 = vst [vmem:[%s415_s12] sm:$0xff] %v2324_v27 }
0x10bf   : > { %2988 = shalt.err (!%p2985_p1)
}
0x10c0   : > { %s2989_s21 = scalar_lea.hbm %s3581_s24, 256  ;;  %s2993_s30 = scalar_lea.hbm %s3634_s10, 512 }
0x10c1   : > { %p2990_p2 = scmp.ne.s32.totalorder %s3581_s24, %s2989_s21  ;;  %p2994_p7 = scmp.lt.s32.totalorder %s3581_s24, %s3634_s10 }
0x10c2   : > { %p2995_p8 = scmp.lt.s32.totalorder %s2993_s30, %s2989_s21 }
0x10c3   : > { %p2991_p3 = pnand %p2990_p2, %p3162_p5 }
0x10c4   : > { %p2996_p6 = por %p2995_p8, %p2994_p7 }
0x10c5   : > { %p2992_p4 = pneg %p2991_p3 }
0x10c7   : > { %p2997_p9 = pnand %p2996_p6, %p2992_p4 }
0x10c9   : > { %3000 = shalt.err (!%p2997_p9)
}
0x10ca   : > { %s3650_s22 = smov 8   ;;  %s3651_s29 = smov 128  }
0x10cb   : > { %2796 = dma.vmem_to_hbm [thread:$0]  (%p3162_p5), %s3574_s13, 256, %s3581_s24, %s2335_s0, %s3651_s29, %s3651_s29, %s3650_s22  }
0x10cc PF: > { %p2813_p10 = scmp.ge.s32.totalorder %s3043_s20, 2  ;;  %s2384_s15 = sand.u32 1, %s3031_s17  }
0x10cd   : > { %p3652_p11 = scmp.ne.s32.totalorder %s3643_s28, 0  ;;  %s2385_s25 = scalar_lea.sflag [#allocation4], %s2384_s15 }
0x10cf   : > { %p2805_p12 = pnand %p2813_p10, %p3652_p11 }
0x10d1   : > { %p2806_p13 = pneg %p2805_p12 }
0x10d3   : > { %3022 = dma.done.wait (%p2806_p13), %s2385_s25, 256  }
0x10d4   : > { %3024 = vsyncadd (%p2806_p13), %s2385_s25, 4294967040  ;;  %s2394_s21 = scalar_lea.sflag [#allocation7], %s2384_s15 }
0x10d5   : > { %3026 = dma.done.wait (%p2806_p13), %s2394_s21, 256  }
0x10d6   : > { %3028 = vsyncadd (%p2806_p13), %s2394_s21, 4294967040  ;;  %p26_p5 = scmp.ge.s32.totalorder %s3149_s23, 4   ;;  %s3653_s17 = smov %s3035_s18 }
0x10d7   : > { %s3654_s18 = smov %s3039_s19  ;;  %s3655_s19 = smov %s3160_s26 }
0x10d8   : > { %s3656_s20 = smov %s3149_s23  ;;  %28 = sbr.rel (!%p26_p5) target bundleno = 9 (0x9), region = 120 }
0x10dd   :  { %2399 = vsyncpa [#allocation3], 1 }
0x10de   :  { %2401 = vsyncpa [#allocation3 + $0x1], 1 }
0x10df   :  { %2402 = vsyncpa [#allocation4], 1 }
0x10e0   :  { %2404 = vsyncpa [#allocation4 + $0x1], 1 }
0x10e1   :  { %2405 = vsyncpa [#allocation7], 1 }
0x10e2   :  { %2407 = vsyncpa [#allocation7 + $0x1], 1 }

</bundles_post_ra>
